<compile_context>
chip_gen: v5e
topology: v5e:2x2
jax: 0.10.0
libtpu: 0.0.40
codegen_flags: <defaults>
</compile_context>

<pallas_src>
import math
from functools import partial

import jax
import jax.numpy as jnp
import numpy as np
from jax.experimental import pallas as pl
from jax.experimental.pallas import tpu as pltpu

FEAT_T = 3  # classifier consumes lstm4 output at timestep 3 (encoder_outputs[-1][3])

_VMEM = pl.BlockSpec(memory_space=pltpu.MemorySpace.VMEM)


# ------------------------------- kernel ------------------------------------ #

def _lstm_scan(B, T, H, xg, mask, whh, h, c):
    """Masked LSTM recurrence over T fully-unrolled steps.

    xg   : (T*B, 4H) precomputed x_t @ W_ih + b (time-major rows)
    mask : (T*B, H) f32 validity mask (1.0 while t < length), lane-broadcast hoisted
    whh  : (H, 4H) recurrent weights (loaded value, hoisted out of the loop)
    Returns (h_final, c_final, h_new_last, mask_last_bool).
    """
    h_new = h
    m_t = mask[0:B] > 0.0
    for t in range(T):                                   # static, tiny trip count
        sl = slice(t * B, (t + 1) * B)
        gates = xg[sl] + jnp.dot(h, whh, preferred_element_type=jnp.float32)  # (B, 4H)
        sig = jax.nn.sigmoid(gates)                      # one EUP pass, all 4 gates
        th = jnp.tanh(gates)                             # one EUP pass
        i = sig[:, 0 * H:1 * H]
        f = sig[:, 1 * H:2 * H]
        g = th[:, 2 * H:3 * H]
        o = sig[:, 3 * H:4 * H]
        c_new = f * c + i * g
        h_new = o * jnp.tanh(c_new)
        m_t = mask[sl] > 0.0
        h = jnp.where(m_t, h_new, h)                     # freeze state once t >= length
        c = jnp.where(m_t, c_new, c)
    return h, c, h_new, m_t


def _fused_kernel(B, H, img_T, T4,
                  x_img_ref, idx_ref, m_ref, wih_img_ref, wih4_ref,
                  whh_ref, b_ref, emb_ref, wcb_ref, y_ref):
    # Hoisted whole-array loads (weights stay in vregs/VMEM for the full kernel).
    whh_all = whh_ref[...]          # (4*H, 4H): rows [k*H:(k+1)*H] = layer k's W_hh
    b_all = b_ref[...]              # (4, 4H)
    x_img = x_img_ref[...]          # ((T1+T2+T3)*B, 9)
    m_all = m_ref[...]              # ((T1+T2+T3+T4)*B, 1) f32

    h = jnp.zeros((B, H), jnp.float32)
    c = jnp.zeros((B, H), jnp.float32)

    # ---- lstm1..lstm3 over image-feature sequences; (h, c) chained layer->layer ----
    x_off = 0
    m_off = 0
    for k, T in enumerate(img_T):
        n = T * B
        # Input projection hoisted off the serial path: one (n, 9) x (9, 4H) matmul.
        xg = (jnp.dot(x_img[x_off:x_off + n, :], wih_img_ref[k],
                      preferred_element_type=jnp.float32) + b_all[k:k + 1])
        mk = jnp.broadcast_to(m_all[m_off:m_off + n, :], (n, H))   # hoisted broadcast
        h, c, _, _ = _lstm_scan(B, T, H, xg, mk, whh_all[k * H:(k + 1) * H], h, c)
        x_off += n
        m_off += n

    # ---- lstm4 over the embedded sentence (embedding gather fused as one-hot matmul) ----
    n4 = T4 * B
    V = emb_ref.shape[0]
    idx = idx_ref[...]                                              # (n4, 1) int32
    onehot = (jax.lax.broadcasted_iota(jnp.int32, (n4, V), 1) == idx).astype(jnp.float32)
    x4 = jnp.dot(onehot, emb_ref[...], preferred_element_type=jnp.float32)      # (n4, E)
    xg4 = (jnp.dot(x4, wih4_ref[...], preferred_element_type=jnp.float32)
           + b_all[3:4])
    m4 = jnp.broadcast_to(m_all[m_off:m_off + n4, :], (n4, H))
    _, _, h_new, m_last = _lstm_scan(B, T4, H, xg4, m4, whh_all[3 * H:4 * H], h, c)

    # encoder_outputs[-1][FEAT_T]: batch row B-1 at timestep FEAT_T (zero if padded).
    feat = jnp.where(m_last, h_new, 0.0)[B - 1:B, :]                # (1, H)
    wcb = wcb_ref[...]                                              # (H+1, 2)
    y_ref[...] = (jnp.dot(feat, wcb[:H, :], preferred_element_type=jnp.float32)
                  + wcb[H:H + 1, :])


# ----------------------------- host wrappers -------------------------------- #

def _time_major_rows(x, B, feat):
    """(B, T*feat) -> time-major rows (T*B, feat): row t*B+b is x[b, t]."""
    x = jnp.asarray(x, jnp.float32).reshape(B, -1, feat)
    return jnp.transpose(x, (1, 0, 2)).reshape(-1, feat)


def _length_mask_rows(lengths, T, B):
    """(T*B, 1) f32 mask: 1.0 while t < len[b], else 0.0 (time-major rows)."""
    t = jnp.arange(T, dtype=jnp.int32)[:, None]                     # (T, 1)
    m = (t < jnp.asarray(lengths, jnp.int32)[None, :]).astype(jnp.float32)
    return m.reshape(T * B, 1)


def prepare_params(params):
    """One-time parameter layout prep (runs at parameter load, NOT per forward call).

    Gates keep PyTorch's natural packed (i, f, g, o) order over 4*H contiguous
    lanes, so there is no padding/scatter; everything stays f32.
    """
    wih1, whh1, b1 = params["lstm1"]
    wih2, whh2, b2 = params["lstm2"]
    wih3, whh3, b3 = params["lstm3"]
    wih4, whh4, b4 = params["lstm4"]
    wc, bc = params["classification"]
    f32 = lambda a: jnp.asarray(a, jnp.float32)
    return {
        "embedding": f32(params["embedding"]),                          # (V, E)
        "wih_img": jnp.stack([f32(wih1), f32(wih2), f32(wih3)]),        # (3, 9, 4H)
        "wih4": f32(wih4),                                              # (E, 4H)
        "whh_all": jnp.concatenate([f32(whh1), f32(whh2),
                                    f32(whh3), f32(whh4)], axis=0),     # (4H, 4H)
        "b_all": jnp.concatenate([f32(b1), f32(b2),
                                  f32(b3), f32(b4)], axis=0),           # (4, 4H)
        "wcb": jnp.concatenate([f32(wc), f32(bc)], axis=0),             # (H+1, 2)
    }


def init_params(key, vocab, embed, fea, hidden):
    ks = jax.random.split(key, 7)
    bound = 1.0 / math.sqrt(hidden)

    def u(k, shape):
        return jax.random.uniform(k, shape, jnp.float32, -bound, bound)

    def lstm_params(k, in_size):
        kk = jax.random.split(k, 4)
        wih = u(kk[0], (in_size, 4 * hidden))
        whh = u(kk[1], (hidden, 4 * hidden))
        bias = (u(kk[2], (4 * hidden,)) + u(kk[3], (4 * hidden,))).reshape(1, 4 * hidden)
        return wih, whh, bias

    return {
        "embedding": jax.random.normal(ks[0], (vocab, embed), jnp.float32),
        "lstm1": lstm_params(ks[1], fea),
        "lstm2": lstm_params(ks[2], fea),
        "lstm3": lstm_params(ks[3], fea),
        "lstm4": lstm_params(ks[4], embed),
        "classification": (u(ks[5], (hidden, 2)), u(ks[6], (1, 2))),
    }


@partial(jax.jit, static_argnames=("batch_size", "embed_size", "hidden_size"))
def forward(prepped, input1, input2, input3, input_sen,
            input1_len, input2_len, input3_len, input_sen_len,
            batch_size, embed_size, hidden_size):
    del embed_size  # embedding lookup happens inside the kernel
    B, H = batch_size, hidden_size

    # Image-feature sequences, time-major rows, concatenated into one operand.
    x1 = _time_major_rows(input1, B, 9)
    x2 = _time_major_rows(input2, B, 9)
    x3 = _time_major_rows(input3, B, 9)
    T1, T2, T3 = x1.shape[0] // B, x2.shape[0] // B, x3.shape[0] // B
    x_img = jnp.concatenate([x1, x2, x3], axis=0)                   # ((T1+T2+T3)*B, 9)

    T_sen = input_sen.shape[1]
    assert T_sen > FEAT_T, "classifier reads encoder_outputs[-1][3]; need >= 4 sentence steps"
    T4 = FEAT_T + 1          # later timesteps never influence y_pred -> skipped
    idx = jnp.transpose(jnp.asarray(input_sen, jnp.int32)[:, :T4]).reshape(T4 * B, 1)

    masks = jnp.concatenate([
        _length_mask_rows(input1_len, T1, B),
        _length_mask_rows(input2_len, T2, B),
        _length_mask_rows(input3_len, T3, B),
        _length_mask_rows(input_sen_len, T_sen, B)[:T4 * B],
    ], axis=0)                                                       # (sum(T)*B, 1)

    y = pl.pallas_call(
        partial(_fused_kernel, B, H, (T1, T2, T3), T4),
        out_shape=jax.ShapeDtypeStruct((1, 2), jnp.float32),
        in_specs=[_VMEM] * 9,
        out_specs=_VMEM,
    )(x_img, idx, masks, prepped["wih_img"], prepped["wih4"],
      prepped["whh_all"], prepped["b_all"], prepped["embedding"], prepped["wcb"])
    return y.reshape(2)


# --------------------------- pure-JAX reference ----------------------------- #

def _ref_lstm_layer(x, lengths, wih, whh, bias, h, c):
    """x: (B, T, I). Returns final (h, c) and zero-padded outputs (B, T, H)."""
    B, T, _ = x.shape
    H = whh.shape[0]
    xg = jnp.einsum("bti,ig->btg", x, wih) + bias[0]
    outs = []
    lengths = jnp.asarray(lengths, jnp.int32)
    for t in range(T):
        gates = xg[:, t] + h @ whh
        i = jax.nn.sigmoid(gates[:, 0 * H:1 * H])
        f = jax.nn.sigmoid(gates[:, 1 * H:2 * H])
        g = jnp.tanh(gates[:, 2 * H:3 * H])
        o = jax.nn.sigmoid(gates[:, 3 * H:4 * H])
        c_new = f * c + i * g
        h_new = o * jnp.tanh(c_new)
        m = (t < lengths)[:, None].astype(jnp.float32)
        h = m * h_new + (1.0 - m) * h
        c = m * c_new + (1.0 - m) * c
        outs.append(m * h_new)
    return h, c, jnp.stack(outs, axis=1)


def forward_ref(params, input1, input2, input3, input_sen,
                l1, l2, l3, l4, B, E, H):
    prep = lambda x: jnp.asarray(x, jnp.float32).reshape(B, -1, 9)
    h = jnp.zeros((B, H), jnp.float32)
    c = jnp.zeros((B, H), jnp.float32)
    h, c, _ = _ref_lstm_layer(prep(input1), l1, *params["lstm1"], h, c)
    h, c, _ = _ref_lstm_layer(prep(input2), l2, *params["lstm2"], h, c)
    h, c, _ = _ref_lstm_layer(prep(input3), l3, *params["lstm3"], h, c)
    emb = jnp.take(params["embedding"], jnp.asarray(input_sen, jnp.int32), axis=0)
    _, _, outs = _ref_lstm_layer(emb.reshape(B, -1, E), l4, *params["lstm4"], h, c)
    wc, bc = params["classification"]
    return outs[B - 1, FEAT_T] @ wc + bc[0]


# ---------------------------------- main ------------------------------------ #

if __name__ == "__main__":
    B = 2
    VOCAB, EMBED, FEA, HIDDEN = 16, 32, 9, 32
    T_IMG, T_SEN = 6, 8

    key = jax.random.PRNGKey(0)
    pkey, k1, k2, k3, k4 = jax.random.split(key, 5)
    params = init_params(pkey, VOCAB, EMBED, FEA, HIDDEN)
    prepped = prepare_params(params)   # one-time layout prep, outside forward

    input1 = jax.random.normal(k1, (B, T_IMG * FEA), jnp.float32)
    input2 = jax.random.normal(k2, (B, T_IMG * FEA), jnp.float32)
    input3 = jax.random.normal(k3, (B, T_IMG * FEA), jnp.float32)
    input_sen = jax.random.randint(k4, (B, T_SEN), 0, VOCAB)

    # pack_padded_sequence(enforce_sorted=True) requires descending lengths.
    input1_len = jnp.array([6, 5], jnp.int32)
    input2_len = jnp.array([6, 4], jnp.int32)
    input3_len = jnp.array([6, 6], jnp.int32)
    input_sen_len = jnp.array([8, 6], jnp.int32)

    y = forward(prepped, input1, input2, input3, input_sen,
                input1_len, input2_len, input3_len, input_sen_len,
                batch_size=B, embed_size=EMBED, hidden_size=HIDDEN)
    jax.block_until_ready(y)
    assert y.shape == (2,) and y.dtype == jnp.float32

    # Cross-check against a plain-JAX reference of the PyTorch forward
    # (loose tolerance: MXU f32 matmul precision differs slightly from XLA's).
    y_ref = forward_ref(params, input1, input2, input3, input_sen,
                        input1_len, input2_len, input3_len, input_sen_len,
                        B, EMBED, HIDDEN)
    np.testing.assert_allclose(np.asarray(y), np.asarray(y_ref), rtol=5e-2, atol=5e-2)

    print("KERNEL_OK")
</pallas_src>

<mosaic_0001>
module attributes {stable_mosaic.version = 11 : i64} {
  func.func @_fused_kernel(%arg0: memref<36x9xf32, #tpu.memory_space<vmem>>, %arg1: memref<8x1xi32, #tpu.memory_space<vmem>>, %arg2: memref<44x1xf32, #tpu.memory_space<vmem>>, %arg3: memref<3x9x128xf32, #tpu.memory_space<vmem>>, %arg4: memref<32x128xf32, #tpu.memory_space<vmem>>, %arg5: memref<128x128xf32, #tpu.memory_space<vmem>>, %arg6: memref<4x128xf32, #tpu.memory_space<vmem>>, %arg7: memref<16x32xf32, #tpu.memory_space<vmem>>, %arg8: memref<33x2xf32, #tpu.memory_space<vmem>>, %arg9: memref<1x2xf32, #tpu.memory_space<vmem>>) attributes {dimension_semantics = [], scalar_prefetch = 0 : i64, scratch_operands = 0 : i64, tpu.core_type = #tpu.core_type<tc>} {
    %c0 = arith.constant 0 : index
    %c0_0 = arith.constant 0 : index
    %0 = vector.load %arg5[%c0, %c0_0] : memref<128x128xf32, #tpu.memory_space<vmem>>, vector<128x128xf32>
    %c0_1 = arith.constant 0 : index
    %c0_2 = arith.constant 0 : index
    %1 = vector.load %arg6[%c0_1, %c0_2] : memref<4x128xf32, #tpu.memory_space<vmem>>, vector<4x128xf32>
    %c0_3 = arith.constant 0 : index
    %c0_4 = arith.constant 0 : index
    %2 = vector.load %arg0[%c0_3, %c0_4] : memref<36x9xf32, #tpu.memory_space<vmem>>, vector<36x9xf32>
    %c0_5 = arith.constant 0 : index
    %c0_6 = arith.constant 0 : index
    %3 = vector.load %arg2[%c0_5, %c0_6] : memref<44x1xf32, #tpu.memory_space<vmem>>, vector<44x1xf32>
    %cst = arith.constant 0.000000e+00 : f32
    %4 = vector.broadcast %cst : f32 to vector<2x32xf32>
    %cst_7 = arith.constant 0.000000e+00 : f32
    %5 = vector.broadcast %cst_7 : f32 to vector<2x32xf32>
    %6 = vector.extract_strided_slice %2 {offsets = [0, 0], sizes = [12, 9], strides = [1, 1]} : vector<36x9xf32> to vector<12x9xf32>
    %c0_8 = arith.constant 0 : index
    %c0_9 = arith.constant 0 : index
    %c0_10 = arith.constant 0 : index
    %7 = vector.load %arg3[%c0_8, %c0_9, %c0_10] : memref<3x9x128xf32, #tpu.memory_space<vmem>>, vector<1x9x128xf32>
    %8 = vector.shape_cast %7 : vector<1x9x128xf32> to vector<9x128xf32>
    %cst_11 = arith.constant dense<0.000000e+00> : vector<12x128xf32>
    %9 = tpu.matmul %6, %8, %cst_11 {dimension_numbers = #tpu.dot_dimension_numbers<[1], [0], [0], [1], [0, 0, 1, 1], [], []>} : vector<12x9xf32>, vector<9x128xf32>, vector<12x128xf32> -> vector<12x128xf32>
    %10 = vector.extract_strided_slice %1 {offsets = [0, 0], sizes = [1, 128], strides = [1, 1]} : vector<4x128xf32> to vector<1x128xf32>
    %11 = vector.broadcast %10 : vector<1x128xf32> to vector<12x128xf32>
    %12 = arith.addf %9, %11 : vector<12x128xf32>
    %13 = vector.extract_strided_slice %3 {offsets = [0, 0], sizes = [12, 1], strides = [1, 1]} : vector<44x1xf32> to vector<12x1xf32>
    %14 = vector.shape_cast %13 : vector<12x1xf32> to vector<12x1xf32>
    %15 = vector.broadcast %14 : vector<12x1xf32> to vector<12x32xf32>
    %16 = vector.extract_strided_slice %0 {offsets = [0, 0], sizes = [32, 128], strides = [1, 1]} : vector<128x128xf32> to vector<32x128xf32>
    %17 = vector.extract_strided_slice %12 {offsets = [0, 0], sizes = [2, 128], strides = [1, 1]} : vector<12x128xf32> to vector<2x128xf32>
    %cst_12 = arith.constant dense<0.000000e+00> : vector<2x128xf32>
    %18 = tpu.matmul %4, %16, %cst_12 {dimension_numbers = #tpu.dot_dimension_numbers<[1], [0], [0], [1], [0, 0, 1, 1], [], []>} : vector<2x32xf32>, vector<32x128xf32>, vector<2x128xf32> -> vector<2x128xf32>
    %19 = arith.addf %17, %18 : vector<2x128xf32>
    %20 = arith.negf %19 : vector<2x128xf32>
    %21 = math.exp %20 : vector<2x128xf32>
    %cst_13 = arith.constant 1.000000e+00 : f32
    %22 = vector.broadcast %cst_13 : f32 to vector<2x128xf32>
    %23 = arith.addf %22, %21 : vector<2x128xf32>
    %24 = arith.divf %22, %23 : vector<2x128xf32>
    %25 = math.tanh %19 : vector<2x128xf32>
    %26 = vector.extract_strided_slice %24 {offsets = [0, 0], sizes = [2, 32], strides = [1, 1]} : vector<2x128xf32> to vector<2x32xf32>
    %27 = vector.extract_strided_slice %24 {offsets = [0, 32], sizes = [2, 32], strides = [1, 1]} : vector<2x128xf32> to vector<2x32xf32>
    %28 = vector.extract_strided_slice %25 {offsets = [0, 64], sizes = [2, 32], strides = [1, 1]} : vector<2x128xf32> to vector<2x32xf32>
    %29 = vector.extract_strided_slice %24 {offsets = [0, 96], sizes = [2, 32], strides = [1, 1]} : vector<2x128xf32> to vector<2x32xf32>
    %30 = arith.mulf %27, %5 : vector<2x32xf32>
    %31 = arith.mulf %26, %28 : vector<2x32xf32>
    %32 = arith.addf %30, %31 : vector<2x32xf32>
    %33 = math.tanh %32 : vector<2x32xf32>
    %34 = arith.mulf %29, %33 : vector<2x32xf32>
    %35 = vector.extract_strided_slice %15 {offsets = [0, 0], sizes = [2, 32], strides = [1, 1]} : vector<12x32xf32> to vector<2x32xf32>
    %cst_14 = arith.constant 0.000000e+00 : f32
    %36 = vector.broadcast %cst_14 : f32 to vector<2x32xf32>
    %37 = arith.cmpf ogt, %35, %36 : vector<2x32xf32>
    %38 = arith.select %37, %34, %4 : vector<2x32xi1>, vector<2x32xf32>
    %39 = arith.select %37, %32, %5 : vector<2x32xi1>, vector<2x32xf32>
    %40 = vector.extract_strided_slice %12 {offsets = [2, 0], sizes = [2, 128], strides = [1, 1]} : vector<12x128xf32> to vector<2x128xf32>
    %cst_15 = arith.constant dense<0.000000e+00> : vector<2x128xf32>
    %41 = tpu.matmul %38, %16, %cst_15 {dimension_numbers = #tpu.dot_dimension_numbers<[1], [0], [0], [1], [0, 0, 1, 1], [], []>} : vector<2x32xf32>, vector<32x128xf32>, vector<2x128xf32> -> vector<2x128xf32>
    %42 = arith.addf %40, %41 : vector<2x128xf32>
    %43 = arith.negf %42 : vector<2x128xf32>
    %44 = math.exp %43 : vector<2x128xf32>
    %cst_16 = arith.constant 1.000000e+00 : f32
    %45 = vector.broadcast %cst_16 : f32 to vector<2x128xf32>
    %46 = arith.addf %45, %44 : vector<2x128xf32>
    %47 = arith.divf %45, %46 : vector<2x128xf32>
    %48 = math.tanh %42 : vector<2x128xf32>
    %49 = vector.extract_strided_slice %47 {offsets = [0, 0], sizes = [2, 32], strides = [1, 1]} : vector<2x128xf32> to vector<2x32xf32>
    %50 = vector.extract_strided_slice %47 {offsets = [0, 32], sizes = [2, 32], strides = [1, 1]} : vector<2x128xf32> to vector<2x32xf32>
    %51 = vector.extract_strided_slice %48 {offsets = [0, 64], sizes = [2, 32], strides = [1, 1]} : vector<2x128xf32> to vector<2x32xf32>
    %52 = vector.extract_strided_slice %47 {offsets = [0, 96], sizes = [2, 32], strides = [1, 1]} : vector<2x128xf32> to vector<2x32xf32>
    %53 = arith.mulf %50, %39 : vector<2x32xf32>
    %54 = arith.mulf %49, %51 : vector<2x32xf32>
    %55 = arith.addf %53, %54 : vector<2x32xf32>
    %56 = math.tanh %55 : vector<2x32xf32>
    %57 = arith.mulf %52, %56 : vector<2x32xf32>
    %58 = vector.extract_strided_slice %15 {offsets = [2, 0], sizes = [2, 32], strides = [1, 1]} : vector<12x32xf32> to vector<2x32xf32>
    %cst_17 = arith.constant 0.000000e+00 : f32
    %59 = vector.broadcast %cst_17 : f32 to vector<2x32xf32>
    %60 = arith.cmpf ogt, %58, %59 : vector<2x32xf32>
    %61 = arith.select %60, %57, %38 : vector<2x32xi1>, vector<2x32xf32>
    %62 = arith.select %60, %55, %39 : vector<2x32xi1>, vector<2x32xf32>
    %63 = vector.extract_strided_slice %12 {offsets = [4, 0], sizes = [2, 128], strides = [1, 1]} : vector<12x128xf32> to vector<2x128xf32>
    %cst_18 = arith.constant dense<0.000000e+00> : vector<2x128xf32>
    %64 = tpu.matmul %61, %16, %cst_18 {dimension_numbers = #tpu.dot_dimension_numbers<[1], [0], [0], [1], [0, 0, 1, 1], [], []>} : vector<2x32xf32>, vector<32x128xf32>, vector<2x128xf32> -> vector<2x128xf32>
    %65 = arith.addf %63, %64 : vector<2x128xf32>
    %66 = arith.negf %65 : vector<2x128xf32>
    %67 = math.exp %66 : vector<2x128xf32>
    %cst_19 = arith.constant 1.000000e+00 : f32
    %68 = vector.broadcast %cst_19 : f32 to vector<2x128xf32>
    %69 = arith.addf %68, %67 : vector<2x128xf32>
    %70 = arith.divf %68, %69 : vector<2x128xf32>
    %71 = math.tanh %65 : vector<2x128xf32>
    %72 = vector.extract_strided_slice %70 {offsets = [0, 0], sizes = [2, 32], strides = [1, 1]} : vector<2x128xf32> to vector<2x32xf32>
    %73 = vector.extract_strided_slice %70 {offsets = [0, 32], sizes = [2, 32], strides = [1, 1]} : vector<2x128xf32> to vector<2x32xf32>
    %74 = vector.extract_strided_slice %71 {offsets = [0, 64], sizes = [2, 32], strides = [1, 1]} : vector<2x128xf32> to vector<2x32xf32>
    %75 = vector.extract_strided_slice %70 {offsets = [0, 96], sizes = [2, 32], strides = [1, 1]} : vector<2x128xf32> to vector<2x32xf32>
    %76 = arith.mulf %73, %62 : vector<2x32xf32>
    %77 = arith.mulf %72, %74 : vector<2x32xf32>
    %78 = arith.addf %76, %77 : vector<2x32xf32>
    %79 = math.tanh %78 : vector<2x32xf32>
    %80 = arith.mulf %75, %79 : vector<2x32xf32>
    %81 = vector.extract_strided_slice %15 {offsets = [4, 0], sizes = [2, 32], strides = [1, 1]} : vector<12x32xf32> to vector<2x32xf32>
    %cst_20 = arith.constant 0.000000e+00 : f32
    %82 = vector.broadcast %cst_20 : f32 to vector<2x32xf32>
    %83 = arith.cmpf ogt, %81, %82 : vector<2x32xf32>
    %84 = arith.select %83, %80, %61 : vector<2x32xi1>, vector<2x32xf32>
    %85 = arith.select %83, %78, %62 : vector<2x32xi1>, vector<2x32xf32>
    %86 = vector.extract_strided_slice %12 {offsets = [6, 0], sizes = [2, 128], strides = [1, 1]} : vector<12x128xf32> to vector<2x128xf32>
    %cst_21 = arith.constant dense<0.000000e+00> : vector<2x128xf32>
    %87 = tpu.matmul %84, %16, %cst_21 {dimension_numbers = #tpu.dot_dimension_numbers<[1], [0], [0], [1], [0, 0, 1, 1], [], []>} : vector<2x32xf32>, vector<32x128xf32>, vector<2x128xf32> -> vector<2x128xf32>
    %88 = arith.addf %86, %87 : vector<2x128xf32>
    %89 = arith.negf %88 : vector<2x128xf32>
    %90 = math.exp %89 : vector<2x128xf32>
    %cst_22 = arith.constant 1.000000e+00 : f32
    %91 = vector.broadcast %cst_22 : f32 to vector<2x128xf32>
    %92 = arith.addf %91, %90 : vector<2x128xf32>
    %93 = arith.divf %91, %92 : vector<2x128xf32>
    %94 = math.tanh %88 : vector<2x128xf32>
    %95 = vector.extract_strided_slice %93 {offsets = [0, 0], sizes = [2, 32], strides = [1, 1]} : vector<2x128xf32> to vector<2x32xf32>
    %96 = vector.extract_strided_slice %93 {offsets = [0, 32], sizes = [2, 32], strides = [1, 1]} : vector<2x128xf32> to vector<2x32xf32>
    %97 = vector.extract_strided_slice %94 {offsets = [0, 64], sizes = [2, 32], strides = [1, 1]} : vector<2x128xf32> to vector<2x32xf32>
    %98 = vector.extract_strided_slice %93 {offsets = [0, 96], sizes = [2, 32], strides = [1, 1]} : vector<2x128xf32> to vector<2x32xf32>
    %99 = arith.mulf %96, %85 : vector<2x32xf32>
    %100 = arith.mulf %95, %97 : vector<2x32xf32>
    %101 = arith.addf %99, %100 : vector<2x32xf32>
    %102 = math.tanh %101 : vector<2x32xf32>
    %103 = arith.mulf %98, %102 : vector<2x32xf32>
    %104 = vector.extract_strided_slice %15 {offsets = [6, 0], sizes = [2, 32], strides = [1, 1]} : vector<12x32xf32> to vector<2x32xf32>
    %cst_23 = arith.constant 0.000000e+00 : f32
    %105 = vector.broadcast %cst_23 : f32 to vector<2x32xf32>
    %106 = arith.cmpf ogt, %104, %105 : vector<2x32xf32>
    %107 = arith.select %106, %103, %84 : vector<2x32xi1>, vector<2x32xf32>
    %108 = arith.select %106, %101, %85 : vector<2x32xi1>, vector<2x32xf32>
    %109 = vector.extract_strided_slice %12 {offsets = [8, 0], sizes = [2, 128], strides = [1, 1]} : vector<12x128xf32> to vector<2x128xf32>
    %cst_24 = arith.constant dense<0.000000e+00> : vector<2x128xf32>
    %110 = tpu.matmul %107, %16, %cst_24 {dimension_numbers = #tpu.dot_dimension_numbers<[1], [0], [0], [1], [0, 0, 1, 1], [], []>} : vector<2x32xf32>, vector<32x128xf32>, vector<2x128xf32> -> vector<2x128xf32>
    %111 = arith.addf %109, %110 : vector<2x128xf32>
    %112 = arith.negf %111 : vector<2x128xf32>
    %113 = math.exp %112 : vector<2x128xf32>
    %cst_25 = arith.constant 1.000000e+00 : f32
    %114 = vector.broadcast %cst_25 : f32 to vector<2x128xf32>
    %115 = arith.addf %114, %113 : vector<2x128xf32>
    %116 = arith.divf %114, %115 : vector<2x128xf32>
    %117 = math.tanh %111 : vector<2x128xf32>
    %118 = vector.extract_strided_slice %116 {offsets = [0, 0], sizes = [2, 32], strides = [1, 1]} : vector<2x128xf32> to vector<2x32xf32>
    %119 = vector.extract_strided_slice %116 {offsets = [0, 32], sizes = [2, 32], strides = [1, 1]} : vector<2x128xf32> to vector<2x32xf32>
    %120 = vector.extract_strided_slice %117 {offsets = [0, 64], sizes = [2, 32], strides = [1, 1]} : vector<2x128xf32> to vector<2x32xf32>
    %121 = vector.extract_strided_slice %116 {offsets = [0, 96], sizes = [2, 32], strides = [1, 1]} : vector<2x128xf32> to vector<2x32xf32>
    %122 = arith.mulf %119, %108 : vector<2x32xf32>
    %123 = arith.mulf %118, %120 : vector<2x32xf32>
    %124 = arith.addf %122, %123 : vector<2x32xf32>
    %125 = math.tanh %124 : vector<2x32xf32>
    %126 = arith.mulf %121, %125 : vector<2x32xf32>
    %127 = vector.extract_strided_slice %15 {offsets = [8, 0], sizes = [2, 32], strides = [1, 1]} : vector<12x32xf32> to vector<2x32xf32>
    %cst_26 = arith.constant 0.000000e+00 : f32
    %128 = vector.broadcast %cst_26 : f32 to vector<2x32xf32>
    %129 = arith.cmpf ogt, %127, %128 : vector<2x32xf32>
    %130 = arith.select %129, %126, %107 : vector<2x32xi1>, vector<2x32xf32>
    %131 = arith.select %129, %124, %108 : vector<2x32xi1>, vector<2x32xf32>
    %132 = vector.extract_strided_slice %12 {offsets = [10, 0], sizes = [2, 128], strides = [1, 1]} : vector<12x128xf32> to vector<2x128xf32>
    %cst_27 = arith.constant dense<0.000000e+00> : vector<2x128xf32>
    %133 = tpu.matmul %130, %16, %cst_27 {dimension_numbers = #tpu.dot_dimension_numbers<[1], [0], [0], [1], [0, 0, 1, 1], [], []>} : vector<2x32xf32>, vector<32x128xf32>, vector<2x128xf32> -> vector<2x128xf32>
    %134 = arith.addf %132, %133 : vector<2x128xf32>
    %135 = arith.negf %134 : vector<2x128xf32>
    %136 = math.exp %135 : vector<2x128xf32>
    %cst_28 = arith.constant 1.000000e+00 : f32
    %137 = vector.broadcast %cst_28 : f32 to vector<2x128xf32>
    %138 = arith.addf %137, %136 : vector<2x128xf32>
    %139 = arith.divf %137, %138 : vector<2x128xf32>
    %140 = math.tanh %134 : vector<2x128xf32>
    %141 = vector.extract_strided_slice %139 {offsets = [0, 0], sizes = [2, 32], strides = [1, 1]} : vector<2x128xf32> to vector<2x32xf32>
    %142 = vector.extract_strided_slice %139 {offsets = [0, 32], sizes = [2, 32], strides = [1, 1]} : vector<2x128xf32> to vector<2x32xf32>
    %143 = vector.extract_strided_slice %140 {offsets = [0, 64], sizes = [2, 32], strides = [1, 1]} : vector<2x128xf32> to vector<2x32xf32>
    %144 = vector.extract_strided_slice %139 {offsets = [0, 96], sizes = [2, 32], strides = [1, 1]} : vector<2x128xf32> to vector<2x32xf32>
    %145 = arith.mulf %142, %131 : vector<2x32xf32>
    %146 = arith.mulf %141, %143 : vector<2x32xf32>
    %147 = arith.addf %145, %146 : vector<2x32xf32>
    %148 = math.tanh %147 : vector<2x32xf32>
    %149 = arith.mulf %144, %148 : vector<2x32xf32>
    %150 = vector.extract_strided_slice %15 {offsets = [10, 0], sizes = [2, 32], strides = [1, 1]} : vector<12x32xf32> to vector<2x32xf32>
    %cst_29 = arith.constant 0.000000e+00 : f32
    %151 = vector.broadcast %cst_29 : f32 to vector<2x32xf32>
    %152 = arith.cmpf ogt, %150, %151 : vector<2x32xf32>
    %153 = arith.select %152, %149, %130 : vector<2x32xi1>, vector<2x32xf32>
    %154 = arith.select %152, %147, %131 : vector<2x32xi1>, vector<2x32xf32>
    %155 = vector.extract_strided_slice %2 {offsets = [12, 0], sizes = [12, 9], strides = [1, 1]} : vector<36x9xf32> to vector<12x9xf32>
    %c1 = arith.constant 1 : index
    %c0_30 = arith.constant 0 : index
    %c0_31 = arith.constant 0 : index
    %156 = vector.load %arg3[%c1, %c0_30, %c0_31] : memref<3x9x128xf32, #tpu.memory_space<vmem>>, vector<1x9x128xf32>
    %157 = vector.shape_cast %156 : vector<1x9x128xf32> to vector<9x128xf32>
    %cst_32 = arith.constant dense<0.000000e+00> : vector<12x128xf32>
    %158 = tpu.matmul %155, %157, %cst_32 {dimension_numbers = #tpu.dot_dimension_numbers<[1], [0], [0], [1], [0, 0, 1, 1], [], []>} : vector<12x9xf32>, vector<9x128xf32>, vector<12x128xf32> -> vector<12x128xf32>
    %159 = vector.extract_strided_slice %1 {offsets = [1, 0], sizes = [1, 128], strides = [1, 1]} : vector<4x128xf32> to vector<1x128xf32>
    %160 = vector.broadcast %159 : vector<1x128xf32> to vector<12x128xf32>
    %161 = arith.addf %158, %160 : vector<12x128xf32>
    %162 = vector.extract_strided_slice %3 {offsets = [12, 0], sizes = [12, 1], strides = [1, 1]} : vector<44x1xf32> to vector<12x1xf32>
    %163 = vector.shape_cast %162 : vector<12x1xf32> to vector<12x1xf32>
    %164 = vector.broadcast %163 : vector<12x1xf32> to vector<12x32xf32>
    %165 = vector.extract_strided_slice %0 {offsets = [32, 0], sizes = [32, 128], strides = [1, 1]} : vector<128x128xf32> to vector<32x128xf32>
    %166 = vector.extract_strided_slice %161 {offsets = [0, 0], sizes = [2, 128], strides = [1, 1]} : vector<12x128xf32> to vector<2x128xf32>
    %cst_33 = arith.constant dense<0.000000e+00> : vector<2x128xf32>
    %167 = tpu.matmul %153, %165, %cst_33 {dimension_numbers = #tpu.dot_dimension_numbers<[1], [0], [0], [1], [0, 0, 1, 1], [], []>} : vector<2x32xf32>, vector<32x128xf32>, vector<2x128xf32> -> vector<2x128xf32>
    %168 = arith.addf %166, %167 : vector<2x128xf32>
    %169 = arith.negf %168 : vector<2x128xf32>
    %170 = math.exp %169 : vector<2x128xf32>
    %cst_34 = arith.constant 1.000000e+00 : f32
    %171 = vector.broadcast %cst_34 : f32 to vector<2x128xf32>
    %172 = arith.addf %171, %170 : vector<2x128xf32>
    %173 = arith.divf %171, %172 : vector<2x128xf32>
    %174 = math.tanh %168 : vector<2x128xf32>
    %175 = vector.extract_strided_slice %173 {offsets = [0, 0], sizes = [2, 32], strides = [1, 1]} : vector<2x128xf32> to vector<2x32xf32>
    %176 = vector.extract_strided_slice %173 {offsets = [0, 32], sizes = [2, 32], strides = [1, 1]} : vector<2x128xf32> to vector<2x32xf32>
    %177 = vector.extract_strided_slice %174 {offsets = [0, 64], sizes = [2, 32], strides = [1, 1]} : vector<2x128xf32> to vector<2x32xf32>
    %178 = vector.extract_strided_slice %173 {offsets = [0, 96], sizes = [2, 32], strides = [1, 1]} : vector<2x128xf32> to vector<2x32xf32>
    %179 = arith.mulf %176, %154 : vector<2x32xf32>
    %180 = arith.mulf %175, %177 : vector<2x32xf32>
    %181 = arith.addf %179, %180 : vector<2x32xf32>
    %182 = math.tanh %181 : vector<2x32xf32>
    %183 = arith.mulf %178, %182 : vector<2x32xf32>
    %184 = vector.extract_strided_slice %164 {offsets = [0, 0], sizes = [2, 32], strides = [1, 1]} : vector<12x32xf32> to vector<2x32xf32>
    %cst_35 = arith.constant 0.000000e+00 : f32
    %185 = vector.broadcast %cst_35 : f32 to vector<2x32xf32>
    %186 = arith.cmpf ogt, %184, %185 : vector<2x32xf32>
    %187 = arith.select %186, %183, %153 : vector<2x32xi1>, vector<2x32xf32>
    %188 = arith.select %186, %181, %154 : vector<2x32xi1>, vector<2x32xf32>
    %189 = vector.extract_strided_slice %161 {offsets = [2, 0], sizes = [2, 128], strides = [1, 1]} : vector<12x128xf32> to vector<2x128xf32>
    %cst_36 = arith.constant dense<0.000000e+00> : vector<2x128xf32>
    %190 = tpu.matmul %187, %165, %cst_36 {dimension_numbers = #tpu.dot_dimension_numbers<[1], [0], [0], [1], [0, 0, 1, 1], [], []>} : vector<2x32xf32>, vector<32x128xf32>, vector<2x128xf32> -> vector<2x128xf32>
    %191 = arith.addf %189, %190 : vector<2x128xf32>
    %192 = arith.negf %191 : vector<2x128xf32>
    %193 = math.exp %192 : vector<2x128xf32>
    %cst_37 = arith.constant 1.000000e+00 : f32
    %194 = vector.broadcast %cst_37 : f32 to vector<2x128xf32>
    %195 = arith.addf %194, %193 : vector<2x128xf32>
    %196 = arith.divf %194, %195 : vector<2x128xf32>
    %197 = math.tanh %191 : vector<2x128xf32>
    %198 = vector.extract_strided_slice %196 {offsets = [0, 0], sizes = [2, 32], strides = [1, 1]} : vector<2x128xf32> to vector<2x32xf32>
    %199 = vector.extract_strided_slice %196 {offsets = [0, 32], sizes = [2, 32], strides = [1, 1]} : vector<2x128xf32> to vector<2x32xf32>
    %200 = vector.extract_strided_slice %197 {offsets = [0, 64], sizes = [2, 32], strides = [1, 1]} : vector<2x128xf32> to vector<2x32xf32>
    %201 = vector.extract_strided_slice %196 {offsets = [0, 96], sizes = [2, 32], strides = [1, 1]} : vector<2x128xf32> to vector<2x32xf32>
    %202 = arith.mulf %199, %188 : vector<2x32xf32>
    %203 = arith.mulf %198, %200 : vector<2x32xf32>
    %204 = arith.addf %202, %203 : vector<2x32xf32>
    %205 = math.tanh %204 : vector<2x32xf32>
    %206 = arith.mulf %201, %205 : vector<2x32xf32>
    %207 = vector.extract_strided_slice %164 {offsets = [2, 0], sizes = [2, 32], strides = [1, 1]} : vector<12x32xf32> to vector<2x32xf32>
    %cst_38 = arith.constant 0.000000e+00 : f32
    %208 = vector.broadcast %cst_38 : f32 to vector<2x32xf32>
    %209 = arith.cmpf ogt, %207, %208 : vector<2x32xf32>
    %210 = arith.select %209, %206, %187 : vector<2x32xi1>, vector<2x32xf32>
    %211 = arith.select %209, %204, %188 : vector<2x32xi1>, vector<2x32xf32>
    %212 = vector.extract_strided_slice %161 {offsets = [4, 0], sizes = [2, 128], strides = [1, 1]} : vector<12x128xf32> to vector<2x128xf32>
    %cst_39 = arith.constant dense<0.000000e+00> : vector<2x128xf32>
    %213 = tpu.matmul %210, %165, %cst_39 {dimension_numbers = #tpu.dot_dimension_numbers<[1], [0], [0], [1], [0, 0, 1, 1], [], []>} : vector<2x32xf32>, vector<32x128xf32>, vector<2x128xf32> -> vector<2x128xf32>
    %214 = arith.addf %212, %213 : vector<2x128xf32>
    %215 = arith.negf %214 : vector<2x128xf32>
    %216 = math.exp %215 : vector<2x128xf32>
    %cst_40 = arith.constant 1.000000e+00 : f32
    %217 = vector.broadcast %cst_40 : f32 to vector<2x128xf32>
    %218 = arith.addf %217, %216 : vector<2x128xf32>
    %219 = arith.divf %217, %218 : vector<2x128xf32>
    %220 = math.tanh %214 : vector<2x128xf32>
    %221 = vector.extract_strided_slice %219 {offsets = [0, 0], sizes = [2, 32], strides = [1, 1]} : vector<2x128xf32> to vector<2x32xf32>
    %222 = vector.extract_strided_slice %219 {offsets = [0, 32], sizes = [2, 32], strides = [1, 1]} : vector<2x128xf32> to vector<2x32xf32>
    %223 = vector.extract_strided_slice %220 {offsets = [0, 64], sizes = [2, 32], strides = [1, 1]} : vector<2x128xf32> to vector<2x32xf32>
    %224 = vector.extract_strided_slice %219 {offsets = [0, 96], sizes = [2, 32], strides = [1, 1]} : vector<2x128xf32> to vector<2x32xf32>
    %225 = arith.mulf %222, %211 : vector<2x32xf32>
    %226 = arith.mulf %221, %223 : vector<2x32xf32>
    %227 = arith.addf %225, %226 : vector<2x32xf32>
    %228 = math.tanh %227 : vector<2x32xf32>
    %229 = arith.mulf %224, %228 : vector<2x32xf32>
    %230 = vector.extract_strided_slice %164 {offsets = [4, 0], sizes = [2, 32], strides = [1, 1]} : vector<12x32xf32> to vector<2x32xf32>
    %cst_41 = arith.constant 0.000000e+00 : f32
    %231 = vector.broadcast %cst_41 : f32 to vector<2x32xf32>
    %232 = arith.cmpf ogt, %230, %231 : vector<2x32xf32>
    %233 = arith.select %232, %229, %210 : vector<2x32xi1>, vector<2x32xf32>
    %234 = arith.select %232, %227, %211 : vector<2x32xi1>, vector<2x32xf32>
    %235 = vector.extract_strided_slice %161 {offsets = [6, 0], sizes = [2, 128], strides = [1, 1]} : vector<12x128xf32> to vector<2x128xf32>
    %cst_42 = arith.constant dense<0.000000e+00> : vector<2x128xf32>
    %236 = tpu.matmul %233, %165, %cst_42 {dimension_numbers = #tpu.dot_dimension_numbers<[1], [0], [0], [1], [0, 0, 1, 1], [], []>} : vector<2x32xf32>, vector<32x128xf32>, vector<2x128xf32> -> vector<2x128xf32>
    %237 = arith.addf %235, %236 : vector<2x128xf32>
    %238 = arith.negf %237 : vector<2x128xf32>
    %239 = math.exp %238 : vector<2x128xf32>
    %cst_43 = arith.constant 1.000000e+00 : f32
    %240 = vector.broadcast %cst_43 : f32 to vector<2x128xf32>
    %241 = arith.addf %240, %239 : vector<2x128xf32>
    %242 = arith.divf %240, %241 : vector<2x128xf32>
    %243 = math.tanh %237 : vector<2x128xf32>
    %244 = vector.extract_strided_slice %242 {offsets = [0, 0], sizes = [2, 32], strides = [1, 1]} : vector<2x128xf32> to vector<2x32xf32>
    %245 = vector.extract_strided_slice %242 {offsets = [0, 32], sizes = [2, 32], strides = [1, 1]} : vector<2x128xf32> to vector<2x32xf32>
    %246 = vector.extract_strided_slice %243 {offsets = [0, 64], sizes = [2, 32], strides = [1, 1]} : vector<2x128xf32> to vector<2x32xf32>
    %247 = vector.extract_strided_slice %242 {offsets = [0, 96], sizes = [2, 32], strides = [1, 1]} : vector<2x128xf32> to vector<2x32xf32>
    %248 = arith.mulf %245, %234 : vector<2x32xf32>
    %249 = arith.mulf %244, %246 : vector<2x32xf32>
    %250 = arith.addf %248, %249 : vector<2x32xf32>
    %251 = math.tanh %250 : vector<2x32xf32>
    %252 = arith.mulf %247, %251 : vector<2x32xf32>
    %253 = vector.extract_strided_slice %164 {offsets = [6, 0], sizes = [2, 32], strides = [1, 1]} : vector<12x32xf32> to vector<2x32xf32>
    %cst_44 = arith.constant 0.000000e+00 : f32
    %254 = vector.broadcast %cst_44 : f32 to vector<2x32xf32>
    %255 = arith.cmpf ogt, %253, %254 : vector<2x32xf32>
    %256 = arith.select %255, %252, %233 : vector<2x32xi1>, vector<2x32xf32>
    %257 = arith.select %255, %250, %234 : vector<2x32xi1>, vector<2x32xf32>
    %258 = vector.extract_strided_slice %161 {offsets = [8, 0], sizes = [2, 128], strides = [1, 1]} : vector<12x128xf32> to vector<2x128xf32>
    %cst_45 = arith.constant dense<0.000000e+00> : vector<2x128xf32>
    %259 = tpu.matmul %256, %165, %cst_45 {dimension_numbers = #tpu.dot_dimension_numbers<[1], [0], [0], [1], [0, 0, 1, 1], [], []>} : vector<2x32xf32>, vector<32x128xf32>, vector<2x128xf32> -> vector<2x128xf32>
    %260 = arith.addf %258, %259 : vector<2x128xf32>
    %261 = arith.negf %260 : vector<2x128xf32>
    %262 = math.exp %261 : vector<2x128xf32>
    %cst_46 = arith.constant 1.000000e+00 : f32
    %263 = vector.broadcast %cst_46 : f32 to vector<2x128xf32>
    %264 = arith.addf %263, %262 : vector<2x128xf32>
    %265 = arith.divf %263, %264 : vector<2x128xf32>
    %266 = math.tanh %260 : vector<2x128xf32>
    %267 = vector.extract_strided_slice %265 {offsets = [0, 0], sizes = [2, 32], strides = [1, 1]} : vector<2x128xf32> to vector<2x32xf32>
    %268 = vector.extract_strided_slice %265 {offsets = [0, 32], sizes = [2, 32], strides = [1, 1]} : vector<2x128xf32> to vector<2x32xf32>
    %269 = vector.extract_strided_slice %266 {offsets = [0, 64], sizes = [2, 32], strides = [1, 1]} : vector<2x128xf32> to vector<2x32xf32>
    %270 = vector.extract_strided_slice %265 {offsets = [0, 96], sizes = [2, 32], strides = [1, 1]} : vector<2x128xf32> to vector<2x32xf32>
    %271 = arith.mulf %268, %257 : vector<2x32xf32>
    %272 = arith.mulf %267, %269 : vector<2x32xf32>
    %273 = arith.addf %271, %272 : vector<2x32xf32>
    %274 = math.tanh %273 : vector<2x32xf32>
    %275 = arith.mulf %270, %274 : vector<2x32xf32>
    %276 = vector.extract_strided_slice %164 {offsets = [8, 0], sizes = [2, 32], strides = [1, 1]} : vector<12x32xf32> to vector<2x32xf32>
    %cst_47 = arith.constant 0.000000e+00 : f32
    %277 = vector.broadcast %cst_47 : f32 to vector<2x32xf32>
    %278 = arith.cmpf ogt, %276, %277 : vector<2x32xf32>
    %279 = arith.select %278, %275, %256 : vector<2x32xi1>, vector<2x32xf32>
    %280 = arith.select %278, %273, %257 : vector<2x32xi1>, vector<2x32xf32>
    %281 = vector.extract_strided_slice %161 {offsets = [10, 0], sizes = [2, 128], strides = [1, 1]} : vector<12x128xf32> to vector<2x128xf32>
    %cst_48 = arith.constant dense<0.000000e+00> : vector<2x128xf32>
    %282 = tpu.matmul %279, %165, %cst_48 {dimension_numbers = #tpu.dot_dimension_numbers<[1], [0], [0], [1], [0, 0, 1, 1], [], []>} : vector<2x32xf32>, vector<32x128xf32>, vector<2x128xf32> -> vector<2x128xf32>
    %283 = arith.addf %281, %282 : vector<2x128xf32>
    %284 = arith.negf %283 : vector<2x128xf32>
    %285 = math.exp %284 : vector<2x128xf32>
    %cst_49 = arith.constant 1.000000e+00 : f32
    %286 = vector.broadcast %cst_49 : f32 to vector<2x128xf32>
    %287 = arith.addf %286, %285 : vector<2x128xf32>
    %288 = arith.divf %286, %287 : vector<2x128xf32>
    %289 = math.tanh %283 : vector<2x128xf32>
    %290 = vector.extract_strided_slice %288 {offsets = [0, 0], sizes = [2, 32], strides = [1, 1]} : vector<2x128xf32> to vector<2x32xf32>
    %291 = vector.extract_strided_slice %288 {offsets = [0, 32], sizes = [2, 32], strides = [1, 1]} : vector<2x128xf32> to vector<2x32xf32>
    %292 = vector.extract_strided_slice %289 {offsets = [0, 64], sizes = [2, 32], strides = [1, 1]} : vector<2x128xf32> to vector<2x32xf32>
    %293 = vector.extract_strided_slice %288 {offsets = [0, 96], sizes = [2, 32], strides = [1, 1]} : vector<2x128xf32> to vector<2x32xf32>
    %294 = arith.mulf %291, %280 : vector<2x32xf32>
    %295 = arith.mulf %290, %292 : vector<2x32xf32>
    %296 = arith.addf %294, %295 : vector<2x32xf32>
    %297 = math.tanh %296 : vector<2x32xf32>
    %298 = arith.mulf %293, %297 : vector<2x32xf32>
    %299 = vector.extract_strided_slice %164 {offsets = [10, 0], sizes = [2, 32], strides = [1, 1]} : vector<12x32xf32> to vector<2x32xf32>
    %cst_50 = arith.constant 0.000000e+00 : f32
    %300 = vector.broadcast %cst_50 : f32 to vector<2x32xf32>
    %301 = arith.cmpf ogt, %299, %300 : vector<2x32xf32>
    %302 = arith.select %301, %298, %279 : vector<2x32xi1>, vector<2x32xf32>
    %303 = arith.select %301, %296, %280 : vector<2x32xi1>, vector<2x32xf32>
    %304 = vector.extract_strided_slice %2 {offsets = [24, 0], sizes = [12, 9], strides = [1, 1]} : vector<36x9xf32> to vector<12x9xf32>
    %c2 = arith.constant 2 : index
    %c0_51 = arith.constant 0 : index
    %c0_52 = arith.constant 0 : index
    %305 = vector.load %arg3[%c2, %c0_51, %c0_52] : memref<3x9x128xf32, #tpu.memory_space<vmem>>, vector<1x9x128xf32>
    %306 = vector.shape_cast %305 : vector<1x9x128xf32> to vector<9x128xf32>
    %cst_53 = arith.constant dense<0.000000e+00> : vector<12x128xf32>
    %307 = tpu.matmul %304, %306, %cst_53 {dimension_numbers = #tpu.dot_dimension_numbers<[1], [0], [0], [1], [0, 0, 1, 1], [], []>} : vector<12x9xf32>, vector<9x128xf32>, vector<12x128xf32> -> vector<12x128xf32>
    %308 = vector.extract_strided_slice %1 {offsets = [2, 0], sizes = [1, 128], strides = [1, 1]} : vector<4x128xf32> to vector<1x128xf32>
    %309 = vector.broadcast %308 : vector<1x128xf32> to vector<12x128xf32>
    %310 = arith.addf %307, %309 : vector<12x128xf32>
    %311 = vector.extract_strided_slice %3 {offsets = [24, 0], sizes = [12, 1], strides = [1, 1]} : vector<44x1xf32> to vector<12x1xf32>
    %312 = vector.shape_cast %311 : vector<12x1xf32> to vector<12x1xf32>
    %313 = vector.broadcast %312 : vector<12x1xf32> to vector<12x32xf32>
    %314 = vector.extract_strided_slice %0 {offsets = [64, 0], sizes = [32, 128], strides = [1, 1]} : vector<128x128xf32> to vector<32x128xf32>
    %315 = vector.extract_strided_slice %310 {offsets = [0, 0], sizes = [2, 128], strides = [1, 1]} : vector<12x128xf32> to vector<2x128xf32>
    %cst_54 = arith.constant dense<0.000000e+00> : vector<2x128xf32>
    %316 = tpu.matmul %302, %314, %cst_54 {dimension_numbers = #tpu.dot_dimension_numbers<[1], [0], [0], [1], [0, 0, 1, 1], [], []>} : vector<2x32xf32>, vector<32x128xf32>, vector<2x128xf32> -> vector<2x128xf32>
    %317 = arith.addf %315, %316 : vector<2x128xf32>
    %318 = arith.negf %317 : vector<2x128xf32>
    %319 = math.exp %318 : vector<2x128xf32>
    %cst_55 = arith.constant 1.000000e+00 : f32
    %320 = vector.broadcast %cst_55 : f32 to vector<2x128xf32>
    %321 = arith.addf %320, %319 : vector<2x128xf32>
    %322 = arith.divf %320, %321 : vector<2x128xf32>
    %323 = math.tanh %317 : vector<2x128xf32>
    %324 = vector.extract_strided_slice %322 {offsets = [0, 0], sizes = [2, 32], strides = [1, 1]} : vector<2x128xf32> to vector<2x32xf32>
    %325 = vector.extract_strided_slice %322 {offsets = [0, 32], sizes = [2, 32], strides = [1, 1]} : vector<2x128xf32> to vector<2x32xf32>
    %326 = vector.extract_strided_slice %323 {offsets = [0, 64], sizes = [2, 32], strides = [1, 1]} : vector<2x128xf32> to vector<2x32xf32>
    %327 = vector.extract_strided_slice %322 {offsets = [0, 96], sizes = [2, 32], strides = [1, 1]} : vector<2x128xf32> to vector<2x32xf32>
    %328 = arith.mulf %325, %303 : vector<2x32xf32>
    %329 = arith.mulf %324, %326 : vector<2x32xf32>
    %330 = arith.addf %328, %329 : vector<2x32xf32>
    %331 = math.tanh %330 : vector<2x32xf32>
    %332 = arith.mulf %327, %331 : vector<2x32xf32>
    %333 = vector.extract_strided_slice %313 {offsets = [0, 0], sizes = [2, 32], strides = [1, 1]} : vector<12x32xf32> to vector<2x32xf32>
    %cst_56 = arith.constant 0.000000e+00 : f32
    %334 = vector.broadcast %cst_56 : f32 to vector<2x32xf32>
    %335 = arith.cmpf ogt, %333, %334 : vector<2x32xf32>
    %336 = arith.select %335, %332, %302 : vector<2x32xi1>, vector<2x32xf32>
    %337 = arith.select %335, %330, %303 : vector<2x32xi1>, vector<2x32xf32>
    %338 = vector.extract_strided_slice %310 {offsets = [2, 0], sizes = [2, 128], strides = [1, 1]} : vector<12x128xf32> to vector<2x128xf32>
    %cst_57 = arith.constant dense<0.000000e+00> : vector<2x128xf32>
    %339 = tpu.matmul %336, %314, %cst_57 {dimension_numbers = #tpu.dot_dimension_numbers<[1], [0], [0], [1], [0, 0, 1, 1], [], []>} : vector<2x32xf32>, vector<32x128xf32>, vector<2x128xf32> -> vector<2x128xf32>
    %340 = arith.addf %338, %339 : vector<2x128xf32>
    %341 = arith.negf %340 : vector<2x128xf32>
    %342 = math.exp %341 : vector<2x128xf32>
    %cst_58 = arith.constant 1.000000e+00 : f32
    %343 = vector.broadcast %cst_58 : f32 to vector<2x128xf32>
    %344 = arith.addf %343, %342 : vector<2x128xf32>
    %345 = arith.divf %343, %344 : vector<2x128xf32>
    %346 = math.tanh %340 : vector<2x128xf32>
    %347 = vector.extract_strided_slice %345 {offsets = [0, 0], sizes = [2, 32], strides = [1, 1]} : vector<2x128xf32> to vector<2x32xf32>
    %348 = vector.extract_strided_slice %345 {offsets = [0, 32], sizes = [2, 32], strides = [1, 1]} : vector<2x128xf32> to vector<2x32xf32>
    %349 = vector.extract_strided_slice %346 {offsets = [0, 64], sizes = [2, 32], strides = [1, 1]} : vector<2x128xf32> to vector<2x32xf32>
    %350 = vector.extract_strided_slice %345 {offsets = [0, 96], sizes = [2, 32], strides = [1, 1]} : vector<2x128xf32> to vector<2x32xf32>
    %351 = arith.mulf %348, %337 : vector<2x32xf32>
    %352 = arith.mulf %347, %349 : vector<2x32xf32>
    %353 = arith.addf %351, %352 : vector<2x32xf32>
    %354 = math.tanh %353 : vector<2x32xf32>
    %355 = arith.mulf %350, %354 : vector<2x32xf32>
    %356 = vector.extract_strided_slice %313 {offsets = [2, 0], sizes = [2, 32], strides = [1, 1]} : vector<12x32xf32> to vector<2x32xf32>
    %cst_59 = arith.constant 0.000000e+00 : f32
    %357 = vector.broadcast %cst_59 : f32 to vector<2x32xf32>
    %358 = arith.cmpf ogt, %356, %357 : vector<2x32xf32>
    %359 = arith.select %358, %355, %336 : vector<2x32xi1>, vector<2x32xf32>
    %360 = arith.select %358, %353, %337 : vector<2x32xi1>, vector<2x32xf32>
    %361 = vector.extract_strided_slice %310 {offsets = [4, 0], sizes = [2, 128], strides = [1, 1]} : vector<12x128xf32> to vector<2x128xf32>
    %cst_60 = arith.constant dense<0.000000e+00> : vector<2x128xf32>
    %362 = tpu.matmul %359, %314, %cst_60 {dimension_numbers = #tpu.dot_dimension_numbers<[1], [0], [0], [1], [0, 0, 1, 1], [], []>} : vector<2x32xf32>, vector<32x128xf32>, vector<2x128xf32> -> vector<2x128xf32>
    %363 = arith.addf %361, %362 : vector<2x128xf32>
    %364 = arith.negf %363 : vector<2x128xf32>
    %365 = math.exp %364 : vector<2x128xf32>
    %cst_61 = arith.constant 1.000000e+00 : f32
    %366 = vector.broadcast %cst_61 : f32 to vector<2x128xf32>
    %367 = arith.addf %366, %365 : vector<2x128xf32>
    %368 = arith.divf %366, %367 : vector<2x128xf32>
    %369 = math.tanh %363 : vector<2x128xf32>
    %370 = vector.extract_strided_slice %368 {offsets = [0, 0], sizes = [2, 32], strides = [1, 1]} : vector<2x128xf32> to vector<2x32xf32>
    %371 = vector.extract_strided_slice %368 {offsets = [0, 32], sizes = [2, 32], strides = [1, 1]} : vector<2x128xf32> to vector<2x32xf32>
    %372 = vector.extract_strided_slice %369 {offsets = [0, 64], sizes = [2, 32], strides = [1, 1]} : vector<2x128xf32> to vector<2x32xf32>
    %373 = vector.extract_strided_slice %368 {offsets = [0, 96], sizes = [2, 32], strides = [1, 1]} : vector<2x128xf32> to vector<2x32xf32>
    %374 = arith.mulf %371, %360 : vector<2x32xf32>
    %375 = arith.mulf %370, %372 : vector<2x32xf32>
    %376 = arith.addf %374, %375 : vector<2x32xf32>
    %377 = math.tanh %376 : vector<2x32xf32>
    %378 = arith.mulf %373, %377 : vector<2x32xf32>
    %379 = vector.extract_strided_slice %313 {offsets = [4, 0], sizes = [2, 32], strides = [1, 1]} : vector<12x32xf32> to vector<2x32xf32>
    %cst_62 = arith.constant 0.000000e+00 : f32
    %380 = vector.broadcast %cst_62 : f32 to vector<2x32xf32>
    %381 = arith.cmpf ogt, %379, %380 : vector<2x32xf32>
    %382 = arith.select %381, %378, %359 : vector<2x32xi1>, vector<2x32xf32>
    %383 = arith.select %381, %376, %360 : vector<2x32xi1>, vector<2x32xf32>
    %384 = vector.extract_strided_slice %310 {offsets = [6, 0], sizes = [2, 128], strides = [1, 1]} : vector<12x128xf32> to vector<2x128xf32>
    %cst_63 = arith.constant dense<0.000000e+00> : vector<2x128xf32>
    %385 = tpu.matmul %382, %314, %cst_63 {dimension_numbers = #tpu.dot_dimension_numbers<[1], [0], [0], [1], [0, 0, 1, 1], [], []>} : vector<2x32xf32>, vector<32x128xf32>, vector<2x128xf32> -> vector<2x128xf32>
    %386 = arith.addf %384, %385 : vector<2x128xf32>
    %387 = arith.negf %386 : vector<2x128xf32>
    %388 = math.exp %387 : vector<2x128xf32>
    %cst_64 = arith.constant 1.000000e+00 : f32
    %389 = vector.broadcast %cst_64 : f32 to vector<2x128xf32>
    %390 = arith.addf %389, %388 : vector<2x128xf32>
    %391 = arith.divf %389, %390 : vector<2x128xf32>
    %392 = math.tanh %386 : vector<2x128xf32>
    %393 = vector.extract_strided_slice %391 {offsets = [0, 0], sizes = [2, 32], strides = [1, 1]} : vector<2x128xf32> to vector<2x32xf32>
    %394 = vector.extract_strided_slice %391 {offsets = [0, 32], sizes = [2, 32], strides = [1, 1]} : vector<2x128xf32> to vector<2x32xf32>
    %395 = vector.extract_strided_slice %392 {offsets = [0, 64], sizes = [2, 32], strides = [1, 1]} : vector<2x128xf32> to vector<2x32xf32>
    %396 = vector.extract_strided_slice %391 {offsets = [0, 96], sizes = [2, 32], strides = [1, 1]} : vector<2x128xf32> to vector<2x32xf32>
    %397 = arith.mulf %394, %383 : vector<2x32xf32>
    %398 = arith.mulf %393, %395 : vector<2x32xf32>
    %399 = arith.addf %397, %398 : vector<2x32xf32>
    %400 = math.tanh %399 : vector<2x32xf32>
    %401 = arith.mulf %396, %400 : vector<2x32xf32>
    %402 = vector.extract_strided_slice %313 {offsets = [6, 0], sizes = [2, 32], strides = [1, 1]} : vector<12x32xf32> to vector<2x32xf32>
    %cst_65 = arith.constant 0.000000e+00 : f32
    %403 = vector.broadcast %cst_65 : f32 to vector<2x32xf32>
    %404 = arith.cmpf ogt, %402, %403 : vector<2x32xf32>
    %405 = arith.select %404, %401, %382 : vector<2x32xi1>, vector<2x32xf32>
    %406 = arith.select %404, %399, %383 : vector<2x32xi1>, vector<2x32xf32>
    %407 = vector.extract_strided_slice %310 {offsets = [8, 0], sizes = [2, 128], strides = [1, 1]} : vector<12x128xf32> to vector<2x128xf32>
    %cst_66 = arith.constant dense<0.000000e+00> : vector<2x128xf32>
    %408 = tpu.matmul %405, %314, %cst_66 {dimension_numbers = #tpu.dot_dimension_numbers<[1], [0], [0], [1], [0, 0, 1, 1], [], []>} : vector<2x32xf32>, vector<32x128xf32>, vector<2x128xf32> -> vector<2x128xf32>
    %409 = arith.addf %407, %408 : vector<2x128xf32>
    %410 = arith.negf %409 : vector<2x128xf32>
    %411 = math.exp %410 : vector<2x128xf32>
    %cst_67 = arith.constant 1.000000e+00 : f32
    %412 = vector.broadcast %cst_67 : f32 to vector<2x128xf32>
    %413 = arith.addf %412, %411 : vector<2x128xf32>
    %414 = arith.divf %412, %413 : vector<2x128xf32>
    %415 = math.tanh %409 : vector<2x128xf32>
    %416 = vector.extract_strided_slice %414 {offsets = [0, 0], sizes = [2, 32], strides = [1, 1]} : vector<2x128xf32> to vector<2x32xf32>
    %417 = vector.extract_strided_slice %414 {offsets = [0, 32], sizes = [2, 32], strides = [1, 1]} : vector<2x128xf32> to vector<2x32xf32>
    %418 = vector.extract_strided_slice %415 {offsets = [0, 64], sizes = [2, 32], strides = [1, 1]} : vector<2x128xf32> to vector<2x32xf32>
    %419 = vector.extract_strided_slice %414 {offsets = [0, 96], sizes = [2, 32], strides = [1, 1]} : vector<2x128xf32> to vector<2x32xf32>
    %420 = arith.mulf %417, %406 : vector<2x32xf32>
    %421 = arith.mulf %416, %418 : vector<2x32xf32>
    %422 = arith.addf %420, %421 : vector<2x32xf32>
    %423 = math.tanh %422 : vector<2x32xf32>
    %424 = arith.mulf %419, %423 : vector<2x32xf32>
    %425 = vector.extract_strided_slice %313 {offsets = [8, 0], sizes = [2, 32], strides = [1, 1]} : vector<12x32xf32> to vector<2x32xf32>
    %cst_68 = arith.constant 0.000000e+00 : f32
    %426 = vector.broadcast %cst_68 : f32 to vector<2x32xf32>
    %427 = arith.cmpf ogt, %425, %426 : vector<2x32xf32>
    %428 = arith.select %427, %424, %405 : vector<2x32xi1>, vector<2x32xf32>
    %429 = arith.select %427, %422, %406 : vector<2x32xi1>, vector<2x32xf32>
    %430 = vector.extract_strided_slice %310 {offsets = [10, 0], sizes = [2, 128], strides = [1, 1]} : vector<12x128xf32> to vector<2x128xf32>
    %cst_69 = arith.constant dense<0.000000e+00> : vector<2x128xf32>
    %431 = tpu.matmul %428, %314, %cst_69 {dimension_numbers = #tpu.dot_dimension_numbers<[1], [0], [0], [1], [0, 0, 1, 1], [], []>} : vector<2x32xf32>, vector<32x128xf32>, vector<2x128xf32> -> vector<2x128xf32>
    %432 = arith.addf %430, %431 : vector<2x128xf32>
    %433 = arith.negf %432 : vector<2x128xf32>
    %434 = math.exp %433 : vector<2x128xf32>
    %cst_70 = arith.constant 1.000000e+00 : f32
    %435 = vector.broadcast %cst_70 : f32 to vector<2x128xf32>
    %436 = arith.addf %435, %434 : vector<2x128xf32>
    %437 = arith.divf %435, %436 : vector<2x128xf32>
    %438 = math.tanh %432 : vector<2x128xf32>
    %439 = vector.extract_strided_slice %437 {offsets = [0, 0], sizes = [2, 32], strides = [1, 1]} : vector<2x128xf32> to vector<2x32xf32>
    %440 = vector.extract_strided_slice %437 {offsets = [0, 32], sizes = [2, 32], strides = [1, 1]} : vector<2x128xf32> to vector<2x32xf32>
    %441 = vector.extract_strided_slice %438 {offsets = [0, 64], sizes = [2, 32], strides = [1, 1]} : vector<2x128xf32> to vector<2x32xf32>
    %442 = vector.extract_strided_slice %437 {offsets = [0, 96], sizes = [2, 32], strides = [1, 1]} : vector<2x128xf32> to vector<2x32xf32>
    %443 = arith.mulf %440, %429 : vector<2x32xf32>
    %444 = arith.mulf %439, %441 : vector<2x32xf32>
    %445 = arith.addf %443, %444 : vector<2x32xf32>
    %446 = math.tanh %445 : vector<2x32xf32>
    %447 = arith.mulf %442, %446 : vector<2x32xf32>
    %448 = vector.extract_strided_slice %313 {offsets = [10, 0], sizes = [2, 32], strides = [1, 1]} : vector<12x32xf32> to vector<2x32xf32>
    %cst_71 = arith.constant 0.000000e+00 : f32
    %449 = vector.broadcast %cst_71 : f32 to vector<2x32xf32>
    %450 = arith.cmpf ogt, %448, %449 : vector<2x32xf32>
    %451 = arith.select %450, %447, %428 : vector<2x32xi1>, vector<2x32xf32>
    %452 = arith.select %450, %445, %429 : vector<2x32xi1>, vector<2x32xf32>
    %c0_72 = arith.constant 0 : index
    %c0_73 = arith.constant 0 : index
    %453 = vector.load %arg1[%c0_72, %c0_73] : memref<8x1xi32, #tpu.memory_space<vmem>>, vector<8x1xi32>
    %454 = tpu.iota {dimensions = array<i32: 1>} : vector<8x16xi32>
    %455 = vector.broadcast %453 : vector<8x1xi32> to vector<8x16xi32>
    %456 = arith.cmpi eq, %454, %455 : vector<8x16xi32>
    %457 = arith.extui %456 : vector<8x16xi1> to vector<8x16xi32>
    %458 = arith.sitofp %457 : vector<8x16xi32> to vector<8x16xf32>
    %c0_74 = arith.constant 0 : index
    %c0_75 = arith.constant 0 : index
    %459 = vector.load %arg7[%c0_74, %c0_75] : memref<16x32xf32, #tpu.memory_space<vmem>>, vector<16x32xf32>
    %cst_76 = arith.constant dense<0.000000e+00> : vector<8x32xf32>
    %460 = tpu.matmul %458, %459, %cst_76 {dimension_numbers = #tpu.dot_dimension_numbers<[1], [0], [0], [1], [0, 0, 1, 1], [], []>} : vector<8x16xf32>, vector<16x32xf32>, vector<8x32xf32> -> vector<8x32xf32>
    %c0_77 = arith.constant 0 : index
    %c0_78 = arith.constant 0 : index
    %461 = vector.load %arg4[%c0_77, %c0_78] : memref<32x128xf32, #tpu.memory_space<vmem>>, vector<32x128xf32>
    %cst_79 = arith.constant dense<0.000000e+00> : vector<8x128xf32>
    %462 = tpu.matmul %460, %461, %cst_79 {dimension_numbers = #tpu.dot_dimension_numbers<[1], [0], [0], [1], [0, 0, 1, 1], [], []>} : vector<8x32xf32>, vector<32x128xf32>, vector<8x128xf32> -> vector<8x128xf32>
    %463 = vector.extract_strided_slice %1 {offsets = [3, 0], sizes = [1, 128], strides = [1, 1]} : vector<4x128xf32> to vector<1x128xf32>
    %464 = vector.broadcast %463 : vector<1x128xf32> to vector<8x128xf32>
    %465 = arith.addf %462, %464 : vector<8x128xf32>
    %466 = vector.extract_strided_slice %3 {offsets = [36, 0], sizes = [8, 1], strides = [1, 1]} : vector<44x1xf32> to vector<8x1xf32>
    %467 = vector.shape_cast %466 : vector<8x1xf32> to vector<8x1xf32>
    %468 = vector.broadcast %467 : vector<8x1xf32> to vector<8x32xf32>
    %469 = vector.extract_strided_slice %0 {offsets = [96, 0], sizes = [32, 128], strides = [1, 1]} : vector<128x128xf32> to vector<32x128xf32>
    %470 = vector.extract_strided_slice %465 {offsets = [0, 0], sizes = [2, 128], strides = [1, 1]} : vector<8x128xf32> to vector<2x128xf32>
    %cst_80 = arith.constant dense<0.000000e+00> : vector<2x128xf32>
    %471 = tpu.matmul %451, %469, %cst_80 {dimension_numbers = #tpu.dot_dimension_numbers<[1], [0], [0], [1], [0, 0, 1, 1], [], []>} : vector<2x32xf32>, vector<32x128xf32>, vector<2x128xf32> -> vector<2x128xf32>
    %472 = arith.addf %470, %471 : vector<2x128xf32>
    %473 = arith.negf %472 : vector<2x128xf32>
    %474 = math.exp %473 : vector<2x128xf32>
    %cst_81 = arith.constant 1.000000e+00 : f32
    %475 = vector.broadcast %cst_81 : f32 to vector<2x128xf32>
    %476 = arith.addf %475, %474 : vector<2x128xf32>
    %477 = arith.divf %475, %476 : vector<2x128xf32>
    %478 = math.tanh %472 : vector<2x128xf32>
    %479 = vector.extract_strided_slice %477 {offsets = [0, 0], sizes = [2, 32], strides = [1, 1]} : vector<2x128xf32> to vector<2x32xf32>
    %480 = vector.extract_strided_slice %477 {offsets = [0, 32], sizes = [2, 32], strides = [1, 1]} : vector<2x128xf32> to vector<2x32xf32>
    %481 = vector.extract_strided_slice %478 {offsets = [0, 64], sizes = [2, 32], strides = [1, 1]} : vector<2x128xf32> to vector<2x32xf32>
    %482 = vector.extract_strided_slice %477 {offsets = [0, 96], sizes = [2, 32], strides = [1, 1]} : vector<2x128xf32> to vector<2x32xf32>
    %483 = arith.mulf %480, %452 : vector<2x32xf32>
    %484 = arith.mulf %479, %481 : vector<2x32xf32>
    %485 = arith.addf %483, %484 : vector<2x32xf32>
    %486 = math.tanh %485 : vector<2x32xf32>
    %487 = arith.mulf %482, %486 : vector<2x32xf32>
    %488 = vector.extract_strided_slice %468 {offsets = [0, 0], sizes = [2, 32], strides = [1, 1]} : vector<8x32xf32> to vector<2x32xf32>
    %cst_82 = arith.constant 0.000000e+00 : f32
    %489 = vector.broadcast %cst_82 : f32 to vector<2x32xf32>
    %490 = arith.cmpf ogt, %488, %489 : vector<2x32xf32>
    %491 = arith.select %490, %487, %451 : vector<2x32xi1>, vector<2x32xf32>
    %492 = arith.select %490, %485, %452 : vector<2x32xi1>, vector<2x32xf32>
    %493 = vector.extract_strided_slice %465 {offsets = [2, 0], sizes = [2, 128], strides = [1, 1]} : vector<8x128xf32> to vector<2x128xf32>
    %cst_83 = arith.constant dense<0.000000e+00> : vector<2x128xf32>
    %494 = tpu.matmul %491, %469, %cst_83 {dimension_numbers = #tpu.dot_dimension_numbers<[1], [0], [0], [1], [0, 0, 1, 1], [], []>} : vector<2x32xf32>, vector<32x128xf32>, vector<2x128xf32> -> vector<2x128xf32>
    %495 = arith.addf %493, %494 : vector<2x128xf32>
    %496 = arith.negf %495 : vector<2x128xf32>
    %497 = math.exp %496 : vector<2x128xf32>
    %cst_84 = arith.constant 1.000000e+00 : f32
    %498 = vector.broadcast %cst_84 : f32 to vector<2x128xf32>
    %499 = arith.addf %498, %497 : vector<2x128xf32>
    %500 = arith.divf %498, %499 : vector<2x128xf32>
    %501 = math.tanh %495 : vector<2x128xf32>
    %502 = vector.extract_strided_slice %500 {offsets = [0, 0], sizes = [2, 32], strides = [1, 1]} : vector<2x128xf32> to vector<2x32xf32>
    %503 = vector.extract_strided_slice %500 {offsets = [0, 32], sizes = [2, 32], strides = [1, 1]} : vector<2x128xf32> to vector<2x32xf32>
    %504 = vector.extract_strided_slice %501 {offsets = [0, 64], sizes = [2, 32], strides = [1, 1]} : vector<2x128xf32> to vector<2x32xf32>
    %505 = vector.extract_strided_slice %500 {offsets = [0, 96], sizes = [2, 32], strides = [1, 1]} : vector<2x128xf32> to vector<2x32xf32>
    %506 = arith.mulf %503, %492 : vector<2x32xf32>
    %507 = arith.mulf %502, %504 : vector<2x32xf32>
    %508 = arith.addf %506, %507 : vector<2x32xf32>
    %509 = math.tanh %508 : vector<2x32xf32>
    %510 = arith.mulf %505, %509 : vector<2x32xf32>
    %511 = vector.extract_strided_slice %468 {offsets = [2, 0], sizes = [2, 32], strides = [1, 1]} : vector<8x32xf32> to vector<2x32xf32>
    %cst_85 = arith.constant 0.000000e+00 : f32
    %512 = vector.broadcast %cst_85 : f32 to vector<2x32xf32>
    %513 = arith.cmpf ogt, %511, %512 : vector<2x32xf32>
    %514 = arith.select %513, %510, %491 : vector<2x32xi1>, vector<2x32xf32>
    %515 = arith.select %513, %508, %492 : vector<2x32xi1>, vector<2x32xf32>
    %516 = vector.extract_strided_slice %465 {offsets = [4, 0], sizes = [2, 128], strides = [1, 1]} : vector<8x128xf32> to vector<2x128xf32>
    %cst_86 = arith.constant dense<0.000000e+00> : vector<2x128xf32>
    %517 = tpu.matmul %514, %469, %cst_86 {dimension_numbers = #tpu.dot_dimension_numbers<[1], [0], [0], [1], [0, 0, 1, 1], [], []>} : vector<2x32xf32>, vector<32x128xf32>, vector<2x128xf32> -> vector<2x128xf32>
    %518 = arith.addf %516, %517 : vector<2x128xf32>
    %519 = arith.negf %518 : vector<2x128xf32>
    %520 = math.exp %519 : vector<2x128xf32>
    %cst_87 = arith.constant 1.000000e+00 : f32
    %521 = vector.broadcast %cst_87 : f32 to vector<2x128xf32>
    %522 = arith.addf %521, %520 : vector<2x128xf32>
    %523 = arith.divf %521, %522 : vector<2x128xf32>
    %524 = math.tanh %518 : vector<2x128xf32>
    %525 = vector.extract_strided_slice %523 {offsets = [0, 0], sizes = [2, 32], strides = [1, 1]} : vector<2x128xf32> to vector<2x32xf32>
    %526 = vector.extract_strided_slice %523 {offsets = [0, 32], sizes = [2, 32], strides = [1, 1]} : vector<2x128xf32> to vector<2x32xf32>
    %527 = vector.extract_strided_slice %524 {offsets = [0, 64], sizes = [2, 32], strides = [1, 1]} : vector<2x128xf32> to vector<2x32xf32>
    %528 = vector.extract_strided_slice %523 {offsets = [0, 96], sizes = [2, 32], strides = [1, 1]} : vector<2x128xf32> to vector<2x32xf32>
    %529 = arith.mulf %526, %515 : vector<2x32xf32>
    %530 = arith.mulf %525, %527 : vector<2x32xf32>
    %531 = arith.addf %529, %530 : vector<2x32xf32>
    %532 = math.tanh %531 : vector<2x32xf32>
    %533 = arith.mulf %528, %532 : vector<2x32xf32>
    %534 = vector.extract_strided_slice %468 {offsets = [4, 0], sizes = [2, 32], strides = [1, 1]} : vector<8x32xf32> to vector<2x32xf32>
    %cst_88 = arith.constant 0.000000e+00 : f32
    %535 = vector.broadcast %cst_88 : f32 to vector<2x32xf32>
    %536 = arith.cmpf ogt, %534, %535 : vector<2x32xf32>
    %537 = arith.select %536, %533, %514 : vector<2x32xi1>, vector<2x32xf32>
    %538 = arith.select %536, %531, %515 : vector<2x32xi1>, vector<2x32xf32>
    %539 = vector.extract_strided_slice %465 {offsets = [6, 0], sizes = [2, 128], strides = [1, 1]} : vector<8x128xf32> to vector<2x128xf32>
    %cst_89 = arith.constant dense<0.000000e+00> : vector<2x128xf32>
    %540 = tpu.matmul %537, %469, %cst_89 {dimension_numbers = #tpu.dot_dimension_numbers<[1], [0], [0], [1], [0, 0, 1, 1], [], []>} : vector<2x32xf32>, vector<32x128xf32>, vector<2x128xf32> -> vector<2x128xf32>
    %541 = arith.addf %539, %540 : vector<2x128xf32>
    %542 = arith.negf %541 : vector<2x128xf32>
    %543 = math.exp %542 : vector<2x128xf32>
    %cst_90 = arith.constant 1.000000e+00 : f32
    %544 = vector.broadcast %cst_90 : f32 to vector<2x128xf32>
    %545 = arith.addf %544, %543 : vector<2x128xf32>
    %546 = arith.divf %544, %545 : vector<2x128xf32>
    %547 = math.tanh %541 : vector<2x128xf32>
    %548 = vector.extract_strided_slice %546 {offsets = [0, 0], sizes = [2, 32], strides = [1, 1]} : vector<2x128xf32> to vector<2x32xf32>
    %549 = vector.extract_strided_slice %546 {offsets = [0, 32], sizes = [2, 32], strides = [1, 1]} : vector<2x128xf32> to vector<2x32xf32>
    %550 = vector.extract_strided_slice %547 {offsets = [0, 64], sizes = [2, 32], strides = [1, 1]} : vector<2x128xf32> to vector<2x32xf32>
    %551 = vector.extract_strided_slice %546 {offsets = [0, 96], sizes = [2, 32], strides = [1, 1]} : vector<2x128xf32> to vector<2x32xf32>
    %552 = arith.mulf %549, %538 : vector<2x32xf32>
    %553 = arith.mulf %548, %550 : vector<2x32xf32>
    %554 = arith.addf %552, %553 : vector<2x32xf32>
    %555 = math.tanh %554 : vector<2x32xf32>
    %556 = arith.mulf %551, %555 : vector<2x32xf32>
    %557 = vector.extract_strided_slice %468 {offsets = [6, 0], sizes = [2, 32], strides = [1, 1]} : vector<8x32xf32> to vector<2x32xf32>
    %cst_91 = arith.constant 0.000000e+00 : f32
    %558 = vector.broadcast %cst_91 : f32 to vector<2x32xf32>
    %559 = arith.cmpf ogt, %557, %558 : vector<2x32xf32>
    %cst_92 = arith.constant 0.000000e+00 : f32
    %560 = vector.broadcast %cst_92 : f32 to vector<2x32xf32>
    %561 = arith.select %559, %556, %560 : vector<2x32xi1>, vector<2x32xf32>
    %562 = vector.extract_strided_slice %561 {offsets = [1, 0], sizes = [1, 32], strides = [1, 1]} : vector<2x32xf32> to vector<1x32xf32>
    %c0_93 = arith.constant 0 : index
    %c0_94 = arith.constant 0 : index
    %563 = vector.load %arg8[%c0_93, %c0_94] : memref<33x2xf32, #tpu.memory_space<vmem>>, vector<33x2xf32>
    %564 = vector.extract_strided_slice %563 {offsets = [0, 0], sizes = [32, 2], strides = [1, 1]} : vector<33x2xf32> to vector<32x2xf32>
    %cst_95 = arith.constant dense<0.000000e+00> : vector<1x2xf32>
    %565 = tpu.matmul %562, %564, %cst_95 {dimension_numbers = #tpu.dot_dimension_numbers<[1], [0], [0], [1], [0, 0, 1, 1], [], []>} : vector<1x32xf32>, vector<32x2xf32>, vector<1x2xf32> -> vector<1x2xf32>
    %566 = vector.extract_strided_slice %563 {offsets = [32, 0], sizes = [1, 2], strides = [1, 1]} : vector<33x2xf32> to vector<1x2xf32>
    %567 = arith.addf %565, %566 : vector<1x2xf32>
    %c0_96 = arith.constant 0 : index
    %c0_97 = arith.constant 0 : index
    %568 = vector.load %arg9[%c0_96, %c0_97] : memref<1x2xf32, #tpu.memory_space<vmem>>, vector<1x2xf32>
    tpu.vector_store %arg9[%c0_96, %c0_97], %567 {strides = array<i32>} : memref<1x2xf32, #tpu.memory_space<vmem>>, vector<1x2xf32>,
    return
  }
}

</mosaic_0001>

<bundles_post_ra>
// kernel: forward.1
= control target key start
LH: loop header
LB: loop body
LE: loop exit
PB: predicated region body
PF: predicated region fallthrough
CT: control target
= control target key end

     0   :  { %vm71_vm0 = vcmask 1040384   ;;  %vm64_vm1 = vcmask 72704   ;;  %s2851_s0 = inlined_call_operand.vmem [shape: f32[36,9], index: 0, kind: input, shape index: {}]   ;;  %s2852_s1 = inlined_call_operand.vmem [shape: s32[8,1], index: 1, kind: input, shape index: {}]   ;;  %s2853_s2 = inlined_call_operand.vmem [shape: f32[44,1], index: 2, kind: input, shape index: {}]   ;;  %s2854_s3 = inlined_call_operand.vmem [shape: f32[3,9,128], index: 3, kind: input, shape index: {}]   ;;  %s2855_s4 = inlined_call_operand.vmem [shape: f32[32,128], index: 4, kind: input, shape index: {}]   ;;  %s2856_s5 = inlined_call_operand.vmem [shape: f32[128,128], index: 5, kind: input, shape index: {}]   ;;  %s2857_s6 = inlined_call_operand.vmem [shape: f32[4,128], index: 6, kind: input, shape index: {}]   ;;  %s2858_s7 = inlined_call_operand.vmem [shape: f32[16,32], index: 7, kind: input, shape index: {}]   ;;  %s2859_s8 = inlined_call_operand.vmem [shape: f32[33,2], index: 8, kind: input, shape index: {}]   ;;  %s2860_s9 = inlined_call_operand.hbm [shape: f32[1,2], index: 9, kind: output, shape index: {}]  }
   0x1   :  { %v36_v0 = vld [vmem:[%s2856_s5 + $0x18] sm:$0xff]  ;;  %v62_v1 = vld [vmem:[%s2854_s3 + $0x8] sm:$0x1]  ;;  %v35_v2 = vld [vmem:[%s2856_s5 + $0x10] sm:$0xff] }
   0x2   :  { %114 = vmatpush.msra.mxu1 %v36_v0  ;;  %2028 = vmatpush.msk.msra.mxu0 %vm71_vm0, %v62_v1  ;;  %v61_v3 = vld [vmem:[%s2854_s3] sm:$0xff]  ;;  %v34_v5 = vld [vmem:[%s2856_s5 + $0x8] sm:$0xff] }
   0x3   :  { %v50_v4 = vld [vmem:[%s2851_s0] sm:$0xff]  ;;  %185 = vmatpush.msra.mxu2 %v36_v0  ;;  %259 = vmatpush.msra.mxu3 %v36_v0 }
   0x4   :  { %14 = vsyncpa [#allocation3], 0  ;;  %115 = vmatpush.msra.mxu1 %v35_v2  ;;  %90 = vmatpush.msra.mxu0 %v61_v3  ;;  %v33_v6 = vld [vmem:[%s2856_s5] sm:$0xff]  ;;  %v2300_v7 = vmov 0.0   ;;  %s2301_s25 = smov 64   ;;  %s2302_s26 = smov 32  }
   0x5   :  { %2029 = vmatmul.msk.f32.vlgmr.msra.gmra.mxu0 %vm64_vm1, %v50_v4  ;;  %186 = vmatpush.msra.mxu2 %v35_v2  ;;  %v2383_v8 = vld [vmem:[%s2857_s6] sm:$0xf]  ;;  %v2303_v30 = vmov 0   ;;  %vm98_vm7 = vcmask 261120   ;;  %s2304_s28 = smov 96  }
   0x6   :  { %116 = vmatpush.msra.mxu1 %v34_v5  ;;  %260 = vmatpush.msra.mxu3 %v35_v2  ;;  %v63_v9 = vperm.slane %v2383_v8, 0  ;;  %v55_v35 = vld [vmem:[%s2853_s2] sm:$0xff] }
   0x7   :  { %187 = vmatpush.msra.mxu2 %v34_v5  ;;  %2094 = vset.pattern.permute.xlu1 %v2303_v30 }
   0x8   :  { %117 = vmatpush.msra.mxu1 %v33_v6  ;;  %261 = vmatpush.msra.mxu3 %v34_v5 }
   0x9   :  { %118 = vmatmul.f32.vlgmr.msra.gmra.mxu1 %v2300_v7  ;;  %188 = vmatpush.msra.mxu2 %v33_v6 }
   0xa   :  { %262 = vmatpush.msra.mxu3 %v33_v6  ;;  %333 = vmatpush.msrb.mxu1 %v36_v0 }
   0xb   :  { %407 = vmatpush.msrb.mxu2 %v36_v0  ;;  %2095 = vset.pattern.permute.xlu2 %v2303_v30 }
   0xc   :  { %482 = vmatpush.msrb.mxu3 %v36_v0  ;;  %334 = vmatpush.msrb.mxu1 %v35_v2 }
   0xd   :  { %408 = vmatpush.msrb.mxu2 %v35_v2  ;;  %2096 = vset.pattern.permute.xlu0 %v2303_v30 }
   0xe   :  { %483 = vmatpush.msrb.mxu3 %v35_v2  ;;  %335 = vmatpush.msrb.mxu1 %v34_v5 }
   0xf   :  { %409 = vmatpush.msrb.mxu2 %v34_v5 }
  0x10   :  { %484 = vmatpush.msrb.mxu3 %v34_v5  ;;  %336 = vmatpush.msrb.mxu1 %v33_v6 }
  0x11   :  { %410 = vmatpush.msrb.mxu2 %v33_v6 }
  0x12   :  { %485 = vmatpush.msrb.mxu3 %v33_v6 }
  0x82   :  { %v92_v10 = vpop.f32.mrf.mxu0 }
  0x83   :  { %v2388_v11 = vadd.f32 %v92_v10, %v63_v9 }
  0x86   :  { %v119_v12 = vpop.f32.mrf.mxu1 }
  0x87   :  { %v122_v13 = vadd.f32 %v119_v12, %v2388_v11 }
  0x89   :  { %2097 = vtanh.f32 %v122_v13  ;;  %v2031_v15 = vmul.f32 -1.442695, %v122_v13 }
  0x8b   :  { %2099 = vpow2.f32 %v2031_v15 }
  0x8f   :  { %v2098_v14 = vpop.eup %2097 }
  0x90   :  { %145 = vrot.lane.b32.xlu0 %v2098_v14, %s2301_s25 }
  0x91   :  { %v2100_v16 = vpop.eup %2099 }
  0x92   :  { %v126_v17 = vadd.f32 1.0, %v2100_v16 }
  0x94   :  { %2101 = vrcp.f32 %v126_v17  ;;  %v138_v23 = vand.u32 2147483648, %v126_v17  ;;  %vm132_vm3 = vweird.f32 %v126_v17  ;;  %v136_v24 = vand.u32 2147483647, %v126_v17 }
  0x96   :  { %v139_v26 = vor.u32 1.1754944e-38, %v138_v23  ;;  %vm137_vm5 = vcmp.eq.f32.partialorder %v136_v24, 8.507059e+37 }
  0x9a   :  { %v2102_v18 = vpop.eup %2101 }
  0x9b   :  { %v128_v19 = vmul.f32 %v2102_v18, %v126_v17  ;;  %vm133_vm2 = vweird.f32 %v2102_v18 }
  0x9c   :  { %vm134_vm4 = vmor %vm132_vm3, %vm133_vm2 }
  0x9d   :  { %v129_v20 = vsub.f32 1.0, %v128_v19 }
  0x9f   :  { %v130_v21 = vmul.f32 %v2102_v18, %v129_v20 }
  0xa1   :  { %v131_v22 = vadd.f32 %v2102_v18, %v130_v21 }
  0xa3   :  { %v135_v25 = vsel %vm134_vm4, %v2102_v18, %v131_v22 }
  0xa4   :  { %v140_v28 = vsel %vm137_vm5, %v139_v26, %v135_v25 }
  0xa5   :  { %v143_v31 = vmul.f32 0.0, %v140_v28 }
 0x102   :  { %v146_v27 = vpop.permute.xlu0 %145 }
 0x103   :  { %v148_v29 = vmul.f32 %v146_v27, %v140_v28 }
 0x105   :  { %150 = vrot.lane.b32.xlu0 %v148_v29, %s2302_s26 }
 0x177   :  { %v151_v32 = vpop.permute.xlu0 %150 }
 0x178   :  { %v153_v33 = vadd.f32 %v151_v32, %v143_v31 }
 0x17a   :  { %2103 = vtanh.f32 %v153_v33 }
 0x180   :  { %v2104_v34 = vpop.eup %2103 }
 0x181   :  { %156 = vrot.lane.b32.xlu1 %v2104_v34, %s2301_s25 }
 0x189   :  { %162 = vperm.xlu1 %2094, %v55_v35  }
 0x1f3   :  { %v157_v36 = vpop.permute.xlu1 %156 }
 0x1f4   :  { %v159_v37 = vmul.f32 %v157_v36, %v140_v28 }
 0x1fb   :  { %v2397_v38 = vpop.permute.xlu1 %162 }
 0x1fc   :  { %vm165_vm6 = vcmp.gt.f32.partialorder %v2397_v38, 0.0 }
 0x1fd   :  { %v166_v39 = vsel %vm165_vm6, %v159_v37, 0.0  ;;  %v167_v60 = vsel %vm165_vm6, %v153_v33, 0.0 }
 0x1fe   :  { %169 = vrot.lane.b32.xlu2 %v166_v39, %s2302_s26  ;;  %v218_v61 = vrot.slane %v167_v60, 6  ;;  %v237_v3 = vrot.slane %v166_v39, 6 }
 0x258   :  { %v170_v40 = vpop.permute.xlu2 %169 }
 0x259   :  { %2032 = vmatmul.msk.f32.vlgmr.msra.gmra.mxu2 %vm98_vm7, %v170_v40 }
 0x2dc   :  { %v190_v41 = vpop.f32.mrf.mxu2 }
 0x2dd   :  { %v194_v42 = vrot.slane %v190_v41, 6 }
 0x2df   :  { %v196_v43 = vadd.f32 %v194_v42, %v2388_v11 }
 0x2e1   :  { %2105 = vtanh.f32 %v196_v43  ;;  %v2033_v45 = vmul.f32 -1.442695, %v196_v43 }
 0x2e3   :  { %2107 = vpow2.f32 %v2033_v45 }
 0x2e7   :  { %v2106_v44 = vpop.eup %2105 }
 0x2e8   :  { %222 = vrot.lane.b32.xlu2 %v2106_v44, %s2301_s25 }
 0x2e9   :  { %v2108_v46 = vpop.eup %2107 }
 0x2ea   :  { %v200_v47 = vadd.f32 1.0, %v2108_v46 }
 0x2ec   :  { %2109 = vrcp.f32 %v200_v47  ;;  %v212_v53 = vand.u32 2147483648, %v200_v47  ;;  %vm206_vm9 = vweird.f32 %v200_v47  ;;  %v210_v54 = vand.u32 2147483647, %v200_v47 }
 0x2ee   :  { %v213_v56 = vor.u32 1.1754944e-38, %v212_v53  ;;  %vm211_vm11 = vcmp.eq.f32.partialorder %v210_v54, 8.507059e+37 }
 0x2f2   :  { %v2110_v48 = vpop.eup %2109 }
 0x2f3   :  { %v202_v49 = vmul.f32 %v2110_v48, %v200_v47  ;;  %vm207_vm8 = vweird.f32 %v2110_v48 }
 0x2f4   :  { %vm208_vm10 = vmor %vm206_vm9, %vm207_vm8 }
 0x2f5   :  { %v203_v50 = vsub.f32 1.0, %v202_v49 }
 0x2f7   :  { %v204_v51 = vmul.f32 %v2110_v48, %v203_v50 }
 0x2f9   :  { %v205_v52 = vadd.f32 %v2110_v48, %v204_v51 }
 0x2fb   :  { %v209_v55 = vsel %vm208_vm10, %v2110_v48, %v205_v52 }
 0x2fc   :  { %v214_v58 = vsel %vm211_vm11, %v213_v56, %v209_v55 }
 0x2fd   :  { %v220_v62 = vmul.f32 %v218_v61, %v214_v58 }
 0x342   :  { %v223_v57 = vpop.permute.xlu2 %222 }
 0x343   :  { %v225_v59 = vmul.f32 %v223_v57, %v214_v58 }
 0x345   :  { %227 = vrot.lane.b32.xlu0 %v225_v59, %s2302_s26 }
 0x3b7   :  { %v228_v63 = vpop.permute.xlu0 %227 }
 0x3b8   :  { %v230_v0 = vadd.f32 %v228_v63, %v220_v62 }
 0x3ba   :  { %2111 = vtanh.f32 %v230_v0  ;;  %v240_v31 = vsel %vm165_vm6, %v230_v0, %v218_v61 }
 0x3bb   :  { %v292_v32 = vrot.slane %v240_v31, 6 }
 0x3c0   :  { %v2112_v1 = vpop.eup %2111 }
 0x3c1   :  { %233 = vrot.lane.b32.xlu1 %v2112_v1, %s2301_s25 }
 0x433   :  { %v234_v2 = vpop.permute.xlu1 %233 }
 0x434   :  { %v236_v4 = vmul.f32 %v234_v2, %v214_v58 }
 0x436   :  { %v239_v5 = vsel %vm165_vm6, %v236_v4, %v237_v3 }
 0x437   :  { %v242_v6 = vrot.slane %v239_v5, 2  ;;  %v311_v39 = vrot.slane %v239_v5, 6 }
 0x439   :  { %243 = vrot.lane.b32.xlu2 %v242_v6, %s2302_s26 }
 0x493   :  { %v244_v10 = vpop.permute.xlu2 %243 }
 0x494   :  { %2034 = vmatmul.msk.f32.vlgmr.msra.gmra.mxu3 %vm98_vm7, %v244_v10 }
 0x517   :  { %v264_v12 = vpop.f32.mrf.mxu3 }
 0x518   :  { %v268_v13 = vrot.slane %v264_v12, 4 }
 0x51a   :  { %v270_v14 = vadd.f32 %v268_v13, %v2388_v11  ;;  %v2436_v13 = vld [vmem:[%s2851_s0 + $0x8] sm:$0xff] }
 0x51b   :  { %2030 = vmatmul.msk.f32.gmra.mxu0 %vm64_vm1, %v2436_v13 }
 0x51c   :  { %2113 = vtanh.f32 %v270_v14  ;;  %v2035_v16 = vmul.f32 -1.442695, %v270_v14 }
 0x51e   :  { %2115 = vpow2.f32 %v2035_v16 }
 0x522   :  { %v2114_v15 = vpop.eup %2113 }
 0x523   :  { %296 = vrot.lane.b32.xlu0 %v2114_v15, %s2301_s25 }
 0x524   :  { %v2116_v17 = vpop.eup %2115 }
 0x525   :  { %v274_v18 = vadd.f32 1.0, %v2116_v17 }
 0x527   :  { %2117 = vrcp.f32 %v274_v18  ;;  %v286_v24 = vand.u32 2147483648, %v274_v18  ;;  %vm280_vm13 = vweird.f32 %v274_v18  ;;  %v284_v25 = vand.u32 2147483647, %v274_v18 }
 0x529   :  { %v287_v27 = vor.u32 1.1754944e-38, %v286_v24  ;;  %vm285_vm15 = vcmp.eq.f32.partialorder %v284_v25, 8.507059e+37 }
 0x52d   :  { %v2118_v19 = vpop.eup %2117 }
 0x52e   :  { %v276_v20 = vmul.f32 %v2118_v19, %v274_v18  ;;  %vm281_vm12 = vweird.f32 %v2118_v19 }
 0x52f   :  { %vm282_vm14 = vmor %vm280_vm13, %vm281_vm12 }
 0x530   :  { %v277_v21 = vsub.f32 1.0, %v276_v20 }
 0x532   :  { %v278_v22 = vmul.f32 %v2118_v19, %v277_v21 }
 0x534   :  { %v279_v23 = vadd.f32 %v2118_v19, %v278_v22 }
 0x536   :  { %v283_v26 = vsel %vm282_vm14, %v2118_v19, %v279_v23  ;;  %v56_v23 = vld [vmem:[%s2853_s2 + $0x8] sm:$0xff] }
 0x537   :  { %v288_v29 = vsel %vm285_vm15, %v287_v27, %v283_v26 }
 0x538   :  { %v294_v33 = vmul.f32 %v292_v32, %v288_v29 }
 0x595   :  { %v297_v28 = vpop.permute.xlu0 %296 }
 0x596   :  { %v299_v30 = vmul.f32 %v297_v28, %v288_v29 }
 0x598   :  { %301 = vrot.lane.b32.xlu1 %v299_v30, %s2302_s26  ;;  %v95_v15 = vpop.f32.mrf.mxu0 }
 0x599   :  { %v96_v16 = vadd.f32 %v95_v15, %v63_v9  ;;  %v39_v15 = vld [vmem:[%s2856_s5 + $0x30] sm:$0xff] }
 0x60a   :  { %v302_v34 = vpop.permute.xlu1 %301 }
 0x60b   :  { %v304_v35 = vadd.f32 %v302_v34, %v294_v33 }
 0x60d   :  { %2119 = vtanh.f32 %v304_v35  ;;  %v314_v62 = vsel %vm165_vm6, %v304_v35, %v292_v32 }
 0x60e   :  { %v366_v63 = vrot.slane %v314_v62, 6 }
 0x613   :  { %v2120_v36 = vpop.eup %2119 }
 0x614   :  { %307 = vrot.lane.b32.xlu2 %v2120_v36, %s2301_s25 }
 0x66e   :  { %v308_v37 = vpop.permute.xlu2 %307 }
 0x66f   :  { %v310_v40 = vmul.f32 %v308_v37, %v288_v29 }
 0x671   :  { %v313_v41 = vsel %vm165_vm6, %v310_v40, %v311_v39 }
 0x672   :  { %v316_v42 = vrot.slane %v313_v41, 4  ;;  %v385_v5 = vrot.slane %v313_v41, 6 }
 0x674   :  { %317 = vrot.lane.b32.xlu0 %v316_v42, %s2302_s26 }
 0x6e6   :  { %v318_v43 = vpop.permute.xlu0 %317 }
 0x6e7   :  { %2036 = vmatmul.msk.f32.vlgmr.msrb.gmra.mxu1 %vm98_vm7, %v318_v43 }
 0x764   :  { %v338_v44 = vpop.f32.mrf.mxu1 }
 0x765   :  { %v342_v45 = vrot.slane %v338_v44, 2 }
 0x767   :  { %v344_v46 = vadd.f32 %v342_v45, %v2388_v11 }
 0x769   :  { %2121 = vtanh.f32 %v344_v46  ;;  %v2037_v48 = vmul.f32 -1.442695, %v344_v46 }
 0x76b   :  { %2123 = vpow2.f32 %v2037_v48 }
 0x76f   :  { %v2122_v47 = vpop.eup %2121 }
 0x770   :  { %370 = vrot.lane.b32.xlu1 %v2122_v47, %s2301_s25 }
 0x771   :  { %v2124_v49 = vpop.eup %2123 }
 0x772   :  { %v348_v50 = vadd.f32 1.0, %v2124_v49 }
 0x774   :  { %2125 = vrcp.f32 %v348_v50  ;;  %v360_v56 = vand.u32 2147483648, %v348_v50  ;;  %vm354_vm3 = vweird.f32 %v348_v50  ;;  %v358_v57 = vand.u32 2147483647, %v348_v50 }
 0x776   :  { %v361_v58 = vor.u32 1.1754944e-38, %v360_v56  ;;  %vm359_vm5 = vcmp.eq.f32.partialorder %v358_v57, 8.507059e+37 }
 0x77a   :  { %v2126_v51 = vpop.eup %2125 }
 0x77b   :  { %v350_v52 = vmul.f32 %v2126_v51, %v348_v50  ;;  %vm355_vm2 = vweird.f32 %v2126_v51 }
 0x77c   :  { %vm356_vm4 = vmor %vm354_vm3, %vm355_vm2  ;;  %vm543_vm2 = vcmask 1043456  }
 0x77d   :  { %v351_v53 = vsub.f32 1.0, %v350_v52 }
 0x77f   :  { %v352_v54 = vmul.f32 %v2126_v51, %v351_v53 }
 0x781   :  { %v353_v55 = vadd.f32 %v2126_v51, %v352_v54 }
 0x783   :  { %v357_v11 = vsel %vm356_vm4, %v2126_v51, %v353_v55 }
 0x784   :  { %v362_v60 = vsel %vm359_vm5, %v361_v58, %v357_v11 }
 0x785   :  { %v368_v0 = vmul.f32 %v366_v63, %v362_v60 }
 0x7e2   :  { %v371_v59 = vpop.permute.xlu1 %370 }
 0x7e3   :  { %v373_v61 = vmul.f32 %v371_v59, %v362_v60 }
 0x7e5   :  { %375 = vrot.lane.b32.xlu2 %v373_v61, %s2302_s26 }
 0x83f   :  { %v376_v1 = vpop.permute.xlu2 %375 }
 0x840   :  { %v378_v2 = vadd.f32 %v376_v1, %v368_v0 }
 0x842   :  { %2127 = vtanh.f32 %v378_v2  ;;  %v388_v35 = vsel %vm165_vm6, %v378_v2, %v366_v63 }
 0x843   :  { %v437_v36 = vrot.slane %v388_v35, 6 }
 0x848   :  { %v2128_v3 = vpop.eup %2127 }
 0x849   :  { %381 = vrot.lane.b32.xlu0 %v2128_v3, %s2301_s25 }
 0x8bb   :  { %v382_v4 = vpop.permute.xlu0 %381 }
 0x8bc   :  { %v384_v6 = vmul.f32 %v382_v4, %v362_v60 }
 0x8be   :  { %v387_v10 = vsel %vm165_vm6, %v384_v6, %v385_v5  ;;  %v544_v6 = vrot.slane %v2436_v13, 4  ;;  %v52_v13 = vld [vmem:[%s2851_s0 + $0x10] sm:$0xff] }
 0x8bf   :  { %v390_v12 = vrot.slane %v387_v10, 6  ;;  %v2043_v10 = vld [vmem:[%s2854_s3 + $0x18] sm:$0x1] }
 0x8c0   :  { %2044 = vmatpush.msk.msrb.mxu0 %vm71_vm0, %v2043_v10 }
 0x8c1   :  { %391 = vrot.lane.b32.xlu1 %v390_v12, %s2302_s26 }
 0x933   :  { %v392_v14 = vpop.permute.xlu1 %391 }
 0x934   :  { %2038 = vmatmul.msk.f32.vlgmr.msrb.gmra.mxu2 %vm98_vm7, %v392_v14  ;;  %v40_v14 = vld [vmem:[%s2856_s5 + $0x38] sm:$0xff] }
 0x935   :  { %595 = vmatpush.msra.mxu1 %v40_v14  ;;  %680 = vmatpush.msra.mxu2 %v40_v14 }
 0x936   :  { %766 = vmatpush.msra.mxu3 %v40_v14 }
 0x937   :  { %596 = vmatpush.msra.mxu1 %v39_v15  ;;  %681 = vmatpush.msra.mxu2 %v39_v15 }
 0x938   :  { %767 = vmatpush.msra.mxu3 %v39_v15 }
 0x9b7   :  { %v412_v17 = vpop.f32.mrf.mxu2 }
 0x9b8   :  { %v415_v18 = vadd.f32 %v412_v17, %v96_v16  ;;  %v545_v17 = vrot.slane %v52_v13, 4 }
 0x9ba   :  { %2129 = vtanh.f32 %v415_v18  ;;  %v2039_v20 = vmul.f32 -1.442695, %v415_v18  ;;  %v546_v18 = vsel %vm543_vm2, %v544_v6, %v545_v17 }
 0x9bc   :  { %2131 = vpow2.f32 %v2039_v20 }
 0x9c0   :  { %v2130_v19 = vpop.eup %2129 }
 0x9c1   :  { %441 = vrot.lane.b32.xlu2 %v2130_v19, %s2301_s25  ;;  %v37_v19 = vld [vmem:[%s2856_s5 + $0x20] sm:$0xff] }
 0x9c2   :  { %v2132_v21 = vpop.eup %2131 }
 0x9c3   :  { %v419_v22 = vadd.f32 1.0, %v2132_v21 }
 0x9c5   :  { %2133 = vrcp.f32 %v419_v22  ;;  %v431_v28 = vand.u32 2147483648, %v419_v22  ;;  %vm425_vm9 = vweird.f32 %v419_v22  ;;  %v429_v29 = vand.u32 2147483647, %v419_v22 }
 0x9c7   :  { %v432_v31 = vor.u32 1.1754944e-38, %v431_v28  ;;  %vm430_vm11 = vcmp.eq.f32.partialorder %v429_v29, 8.507059e+37 }
 0x9c9   :  { %458 = vperm.xlu2 %2095, %v56_v23  }
 0x9cb   :  { %v2134_v24 = vpop.eup %2133 }
 0x9cc   :  { %v421_v25 = vmul.f32 %v2134_v24, %v419_v22  ;;  %vm426_vm8 = vweird.f32 %v2134_v24 }
 0x9cd   :  { %vm427_vm10 = vmor %vm425_vm9, %vm426_vm8 }
 0x9ce   :  { %v422_v26 = vsub.f32 1.0, %v421_v25 }
 0x9d0   :  { %v423_v9 = vmul.f32 %v2134_v24, %v422_v26  ;;  %v541_v26 = vperm.slane %v2383_v8, 1 }
 0x9d2   :  { %v424_v27 = vadd.f32 %v2134_v24, %v423_v9 }
 0x9d4   :  { %v428_v30 = vsel %vm427_vm10, %v2134_v24, %v424_v27 }
 0x9d5   :  { %v433_v33 = vsel %vm430_vm11, %v432_v31, %v428_v30 }
 0x9d6   :  { %v439_v37 = vmul.f32 %v437_v36, %v433_v33 }
 0xa1b   :  { %v442_v32 = vpop.permute.xlu2 %441 }
 0xa1c   :  { %v444_v34 = vmul.f32 %v442_v32, %v433_v33 }
 0xa1e   :  { %446 = vrot.lane.b32.xlu0 %v444_v34, %s2302_s26 }
 0xa23   :  { %v2451_v42 = vpop.permute.xlu2 %458 }
 0xa24   :  { %vm461_vm12 = vcmp.gt.f32.partialorder %v2451_v42, 0.0 }
 0xa90   :  { %v447_v39 = vpop.permute.xlu0 %446 }
 0xa91   :  { %v449_v40 = vadd.f32 %v447_v39, %v439_v37 }
 0xa93   :  { %2135 = vtanh.f32 %v449_v40  ;;  %v2465_v0 = vsel %vm461_vm12, %v449_v40, %v437_v36 }
 0xa94   :  { %v515_v1 = vrot.slane %v2465_v0, 6 }
 0xa99   :  { %v2136_v41 = vpop.eup %2135 }
 0xa9a   :  { %452 = vrot.lane.b32.xlu1 %v2136_v41, %s2301_s25 }
 0xb0c   :  { %v453_v43 = vpop.permute.xlu1 %452 }
 0xb0d   :  { %v455_v44 = vmul.f32 %v453_v43, %v433_v33 }
 0xb0f   :  { %v2456_v45 = vsel %vm461_vm12, %v455_v44, %v390_v12  ;;  %v2042_v12 = vld [vmem:[%s2854_s3 + $0x10] sm:$0xff] }
 0xb10   :  { %466 = vrot.lane.b32.xlu0 %v2456_v45, %s2302_s26  ;;  %569 = vmatpush.msrb.mxu0 %v2042_v12  ;;  %v534_v21 = vrot.slane %v2456_v45, 6 }
 0xb11   :  { %2045 = vmatmul.msk.f32.vlgmr.msrb.gmra.mxu0 %vm64_vm1, %v546_v18 }
 0xb19   :  { %2046 = vmatmul.msk.f32.gmra.mxu0 %vm64_vm1, %v545_v17 }
 0xb82   :  { %v467_v38 = vpop.permute.xlu0 %466 }
 0xb83   :  { %2040 = vmatmul.msk.f32.vlgmr.msrb.gmra.mxu3 %vm98_vm7, %v467_v38 }
 0xb8e   :  { %v571_v9 = vpop.f32.mrf.mxu0 }
 0xb8f   :  { %v2507_v27 = vadd.f32 %v571_v9, %v541_v26 }
 0xc06   :  { %v487_v46 = vpop.f32.mrf.mxu3 }
 0xc07   :  { %v491_v47 = vrot.slane %v487_v46, 6 }
 0xc09   :  { %v493_v48 = vadd.f32 %v491_v47, %v96_v16  ;;  %v38_v16 = vld [vmem:[%s2856_s5 + $0x28] sm:$0xff] }
 0xc0a   :  { %597 = vmatpush.msra.mxu1 %v38_v16  ;;  %682 = vmatpush.msra.mxu2 %v38_v16 }
 0xc0b   :  { %2137 = vtanh.f32 %v493_v48  ;;  %v2041_v50 = vmul.f32 -1.442695, %v493_v48  ;;  %768 = vmatpush.msra.mxu3 %v38_v16 }
 0xc0c   :  { %598 = vmatpush.msra.mxu1 %v37_v19  ;;  %683 = vmatpush.msra.mxu2 %v37_v19 }
 0xc0d   :  { %2139 = vpow2.f32 %v2041_v50  ;;  %769 = vmatpush.msra.mxu3 %v37_v19 }
 0xc0e   :  { %856 = vmatpush.msrb.mxu1 %v40_v14  ;;  %942 = vmatpush.msrb.mxu2 %v40_v14 }
 0xc0f   :  { %1025 = vmatpush.msrb.mxu3 %v40_v14 }
 0xc10   :  { %857 = vmatpush.msrb.mxu1 %v39_v15  ;;  %943 = vmatpush.msrb.mxu2 %v39_v15 }
 0xc11   :  { %v2138_v49 = vpop.eup %2137  ;;  %1026 = vmatpush.msrb.mxu3 %v39_v15 }
 0xc12   :  { %519 = vrot.lane.b32.xlu1 %v2138_v49, %s2301_s25  ;;  %858 = vmatpush.msrb.mxu1 %v38_v16 }
 0xc13   :  { %v2140_v51 = vpop.eup %2139  ;;  %944 = vmatpush.msrb.mxu2 %v38_v16  ;;  %1027 = vmatpush.msrb.mxu3 %v38_v16 }
 0xc14   :  { %v497_v52 = vadd.f32 1.0, %v2140_v51  ;;  %859 = vmatpush.msrb.mxu1 %v37_v19 }
 0xc15   :  { %945 = vmatpush.msrb.mxu2 %v37_v19  ;;  %1028 = vmatpush.msrb.mxu3 %v37_v19 }
 0xc16   :  { %2141 = vrcp.f32 %v497_v52  ;;  %v509_v11 = vand.u32 2147483648, %v497_v52  ;;  %vm503_vm13 = vweird.f32 %v497_v52  ;;  %v507_v58 = vand.u32 2147483647, %v497_v52 }
 0xc18   :  { %v510_v60 = vor.u32 1.1754944e-38, %v509_v11  ;;  %vm508_vm15 = vcmp.eq.f32.partialorder %v507_v58, 8.507059e+37 }
 0xc1c   :  { %v2142_v53 = vpop.eup %2141 }
 0xc1d   :  { %v499_v54 = vmul.f32 %v2142_v53, %v497_v52  ;;  %vm504_vm6 = vweird.f32 %v2142_v53 }
 0xc1e   :  { %vm505_vm14 = vmor %vm503_vm13, %vm504_vm6 }
 0xc1f   :  { %v500_v55 = vsub.f32 1.0, %v499_v54 }
 0xc21   :  { %v501_v56 = vmul.f32 %v2142_v53, %v500_v55 }
 0xc23   :  { %v502_v57 = vadd.f32 %v2142_v53, %v501_v56 }
 0xc25   :  { %v506_v59 = vsel %vm505_vm14, %v2142_v53, %v502_v57 }
 0xc26   :  { %v511_v62 = vsel %vm508_vm15, %v510_v60, %v506_v59 }
 0xc27   :  { %v517_v2 = vmul.f32 %v515_v1, %v511_v62 }
 0xc84   :  { %v520_v61 = vpop.permute.xlu1 %519 }
 0xc85   :  { %v522_v63 = vmul.f32 %v520_v61, %v511_v62 }
 0xc87   :  { %524 = vrot.lane.b32.xlu2 %v522_v63, %s2302_s26 }
 0xce1   :  { %v525_v3 = vpop.permute.xlu2 %524 }
 0xce2   :  { %v2470_v4 = vadd.f32 %v525_v3, %v517_v2 }
 0xce4   :  { %2143 = vtanh.f32 %v2470_v4  ;;  %v537_v48 = vsel %vm461_vm12, %v2470_v4, %v515_v1 }
 0xce5   :  { %v625_v49 = vrot.slane %v537_v48, 2  ;;  %v659_v11 = vrot.slane %v537_v48, 6 }
 0xcea   :  { %v2144_v5 = vpop.eup %2143 }
 0xceb   :  { %530 = vrot.lane.b32.xlu0 %v2144_v5, %s2301_s25 }
 0xd5d   :  { %v531_v20 = vpop.permute.xlu0 %530 }
 0xd5e   :  { %v533_v22 = vmul.f32 %v531_v20, %v511_v62 }
 0xd60   :  { %v536_v23 = vsel %vm461_vm12, %v533_v22, %v534_v21 }
 0xd61   :  { %v578_v24 = vrot.slane %v536_v23, 2  ;;  %v649_v47 = vrot.slane %v536_v23, 6 }
 0xd63   :  { %579 = vrot.lane.b32.xlu1 %v578_v24, %s2302_s26 }
 0xdd5   :  { %v580_v25 = vpop.permute.xlu1 %579 }
 0xdd6   :  { %2047 = vmatmul.msk.f32.vlgmr.msra.gmra.mxu1 %vm98_vm7, %v580_v25 }
 0xe53   :  { %v600_v28 = vpop.f32.mrf.mxu1 }
 0xe54   :  { %v603_v29 = vadd.f32 %v600_v28, %v2507_v27 }
 0xe56   :  { %2145 = vtanh.f32 %v603_v29  ;;  %v2048_v31 = vmul.f32 -1.442695, %v603_v29 }
 0xe58   :  { %2147 = vpow2.f32 %v2048_v31 }
 0xe5c   :  { %v2146_v30 = vpop.eup %2145 }
 0xe5d   :  { %629 = vrot.lane.b32.xlu2 %v2146_v30, %s2301_s25 }
 0xe5e   :  { %v2148_v32 = vpop.eup %2147 }
 0xe5f   :  { %v607_v33 = vadd.f32 1.0, %v2148_v32 }
 0xe61   :  { %2149 = vrcp.f32 %v607_v33  ;;  %v619_v40 = vand.u32 2147483648, %v607_v33  ;;  %vm613_vm4 = vweird.f32 %v607_v33  ;;  %v617_v41 = vand.u32 2147483647, %v607_v33 }
 0xe63   :  { %v620_v44 = vor.u32 1.1754944e-38, %v619_v40  ;;  %vm618_vm8 = vcmp.eq.f32.partialorder %v617_v41, 8.507059e+37  ;;  %v57_v40 = vld [vmem:[%s2853_s2 + $0x10] sm:$0xff] }
 0xe67   :  { %v2150_v34 = vpop.eup %2149 }
 0xe68   :  { %v609_v35 = vmul.f32 %v2150_v34, %v607_v33  ;;  %vm614_vm3 = vweird.f32 %v2150_v34 }
 0xe69   :  { %vm615_vm5 = vmor %vm613_vm4, %vm614_vm3 }
 0xe6a   :  { %v610_v36 = vsub.f32 1.0, %v609_v35 }
 0xe6c   :  { %v611_v37 = vmul.f32 %v2150_v34, %v610_v36 }
 0xe6e   :  { %v612_v39 = vadd.f32 %v2150_v34, %v611_v37 }
 0xe70   :  { %v616_v43 = vsel %vm615_vm5, %v2150_v34, %v612_v39 }
 0xe71   :  { %v621_v38 = vsel %vm618_vm8, %v620_v44, %v616_v43 }
 0xe72   :  { %v627_v50 = vmul.f32 %v625_v49, %v621_v38 }
 0xeb7   :  { %v630_v45 = vpop.permute.xlu2 %629 }
 0xeb8   :  { %v632_v46 = vmul.f32 %v630_v45, %v621_v38 }
 0xeba   :  { %634 = vrot.lane.b32.xlu0 %v632_v46, %s2302_s26 }
 0xec2   :  { %650 = vrot.lane.b32.xlu0 %v649_v47, %s2302_s26 }
 0xf2c   :  { %v635_v51 = vpop.permute.xlu0 %634 }
 0xf2d   :  { %v637_v52 = vadd.f32 %v635_v51, %v627_v50 }
 0xf2f   :  { %2151 = vtanh.f32 %v637_v52  ;;  %v655_v54 = vrot.slane %v637_v52, 4 }
 0xf34   :  { %v651_v58 = vpop.permute.xlu0 %650 }
 0xf35   :  { %v2152_v53 = vpop.eup %2151 }
 0xf36   :  { %640 = vrot.lane.b32.xlu1 %v2152_v53, %s2301_s25 }
 0xf3e   :  { %656 = vrot.lane.b32.xlu1 %v655_v54, %s2304_s28 }
 0xfa8   :  { %v641_v55 = vpop.permute.xlu1 %640 }
 0xfa9   :  { %v643_v56 = vmul.f32 %v641_v55, %v621_v38 }
 0xfab   :  { %v645_v57 = vrot.slane %v643_v56, 4 }
 0xfad   :  { %646 = vrot.lane.b32.xlu2 %v645_v57, %s2302_s26 }
 0xfb0   :  { %v657_v62 = vpop.permute.xlu1 %656 }
 0xfb5   :  { %660 = vrot.lane.b32.xlu2 %v659_v11, %s2304_s28 }
0x1007   :  { %v647_v59 = vpop.permute.xlu2 %646 }
0x1008   :  { %v653_v60 = vsel %vm461_vm12, %v647_v59, %v651_v58 }
0x1009   :  { %v665_v61 = vrot.slane %v653_v60, 4  ;;  %v739_v41 = vrot.slane %v653_v60, 6 }
0x100b   :  { %2049 = vmatmul.msk.f32.vlgmr.msra.gmra.mxu2 %vm98_vm7, %v665_v61 }
0x100f   :  { %v661_v63 = vpop.permute.xlu2 %660 }
0x1010   :  { %v663_v0 = vsel %vm461_vm12, %v657_v62, %v661_v63 }
0x1011   :  { %v713_v1 = vrot.slane %v663_v0, 2  ;;  %v747_v36 = vrot.slane %v663_v0, 6 }
0x1013   :  { %714 = vrot.lane.b32.xlu1 %v713_v1, %s2302_s26 }
0x1085   :  { %v715_v25 = vpop.permute.xlu1 %714 }
0x108e   :  { %v685_v2 = vpop.f32.mrf.mxu2 }
0x108f   :  { %v689_v3 = vrot.slane %v685_v2, 6 }
0x1091   :  { %v691_v4 = vadd.f32 %v689_v3, %v2507_v27 }
0x1093   :  { %2153 = vtanh.f32 %v691_v4  ;;  %v2050_v6 = vmul.f32 -1.442695, %v691_v4 }
0x1095   :  { %2155 = vpow2.f32 %v2050_v6 }
0x1099   :  { %v2154_v5 = vpop.eup %2153 }
0x109a   :  { %719 = vrot.lane.b32.xlu0 %v2154_v5, %s2301_s25 }
0x109b   :  { %v2156_v10 = vpop.eup %2155 }
0x109c   :  { %v695_v12 = vadd.f32 1.0, %v2156_v10 }
0x109e   :  { %2157 = vrcp.f32 %v695_v12  ;;  %v707_v18 = vand.u32 2147483648, %v695_v12  ;;  %vm701_vm10 = vweird.f32 %v695_v12  ;;  %v705_v19 = vand.u32 2147483647, %v695_v12 }
0x10a0   :  { %v708_v21 = vor.u32 1.1754944e-38, %v707_v18  ;;  %vm706_vm6 = vcmp.eq.f32.partialorder %v705_v19, 8.507059e+37 }
0x10a4   :  { %v2158_v14 = vpop.eup %2157 }
0x10a5   :  { %v697_v15 = vmul.f32 %v2158_v14, %v695_v12  ;;  %vm702_vm9 = vweird.f32 %v2158_v14 }
0x10a6   :  { %vm703_vm11 = vmor %vm701_vm10, %vm702_vm9 }
0x10a7   :  { %v698_v13 = vsub.f32 1.0, %v697_v15 }
0x10a9   :  { %v699_v16 = vmul.f32 %v2158_v14, %v698_v13 }
0x10ab   :  { %v700_v17 = vadd.f32 %v2158_v14, %v699_v16 }
0x10ad   :  { %v704_v20 = vsel %vm703_vm11, %v2158_v14, %v700_v17 }
0x10ae   :  { %v709_v23 = vsel %vm706_vm6, %v708_v21, %v704_v20 }
0x10af   :  { %v717_v9 = vmul.f32 %v715_v25, %v709_v23 }
0x110c   :  { %v720_v22 = vpop.permute.xlu0 %719 }
0x110d   :  { %v722_v24 = vmul.f32 %v720_v22, %v709_v23 }
0x110f   :  { %724 = vrot.lane.b32.xlu2 %v722_v24, %s2302_s26 }
0x1169   :  { %v725_v28 = vpop.permute.xlu2 %724 }
0x116a   :  { %v727_v29 = vadd.f32 %v725_v28, %v717_v9 }
0x116c   :  { %2159 = vtanh.f32 %v727_v29  ;;  %v743_v30 = vrot.slane %v727_v29, 4 }
0x116e   :  { %744 = vrot.lane.b32.xlu2 %v743_v30, %s2304_s28 }
0x1172   :  { %v2160_v31 = vpop.eup %2159 }
0x1173   :  { %730 = vrot.lane.b32.xlu0 %v2160_v31, %s2301_s25 }
0x11c8   :  { %v745_v35 = vpop.permute.xlu2 %744 }
0x11c9   :  { %v749_v37 = vsel %vm461_vm12, %v745_v35, %v747_v36 }
0x11ca   :  { %v799_v39 = vrot.slane %v749_v37, 2  ;;  %v838_v12 = vrot.slane %v749_v37, 6 }
0x11e5   :  { %v731_v32 = vpop.permute.xlu0 %730 }
0x11e6   :  { %v733_v33 = vmul.f32 %v731_v32, %v709_v23 }
0x11e8   :  { %v735_v34 = vrot.slane %v733_v33, 4 }
0x11ea   :  { %736 = vrot.lane.b32.xlu1 %v735_v34, %s2302_s26 }
0x11f2   :  { %800 = vrot.lane.b32.xlu1 %v799_v39, %s2302_s26 }
0x11fa   :  { %822 = vperm.xlu1 %2094, %v57_v40  }
0x125c   :  { %v737_v43 = vpop.permute.xlu1 %736 }
0x125d   :  { %v741_v44 = vsel %vm461_vm12, %v737_v43, %v739_v41 }
0x125e   :  { %v751_v45 = vrot.slane %v741_v44, 6 }
0x1260   :  { %2051 = vmatmul.msk.f32.vlgmr.msra.gmra.mxu3 %vm98_vm7, %v751_v45 }
0x1264   :  { %v801_v62 = vpop.permute.xlu1 %800 }
0x126c   :  { %v2548_v10 = vpop.permute.xlu1 %822 }
0x126d   :  { %vm825_vm2 = vcmp.gt.f32.partialorder %v2548_v10, 0.0 }
0x12e3   :  { %v771_v38 = vpop.f32.mrf.mxu3 }
0x12e4   :  { %v775_v46 = vrot.slane %v771_v38, 4 }
0x12e6   :  { %v777_v47 = vadd.f32 %v775_v46, %v2507_v27 }
0x12e8   :  { %2161 = vtanh.f32 %v777_v47  ;;  %v2052_v49 = vmul.f32 -1.442695, %v777_v47 }
0x12ea   :  { %2163 = vpow2.f32 %v2052_v49 }
0x12ee   :  { %v2162_v48 = vpop.eup %2161 }
0x12ef   :  { %805 = vrot.lane.b32.xlu0 %v2162_v48, %s2301_s25 }
0x12f0   :  { %v2164_v50 = vpop.eup %2163 }
0x12f1   :  { %v781_v51 = vadd.f32 1.0, %v2164_v50 }
0x12f3   :  { %2165 = vrcp.f32 %v781_v51  ;;  %v793_v56 = vand.u32 2147483648, %v781_v51  ;;  %vm787_vm13 = vweird.f32 %v781_v51  ;;  %v791_v57 = vand.u32 2147483647, %v781_v51 }
0x12f5   :  { %v794_v58 = vor.u32 1.1754944e-38, %v793_v56  ;;  %vm792_vm15 = vcmp.eq.f32.partialorder %v791_v57, 8.507059e+37 }
0x12f9   :  { %v2166_v52 = vpop.eup %2165 }
0x12fa   :  { %v783_v53 = vmul.f32 %v2166_v52, %v781_v51  ;;  %vm788_vm12 = vweird.f32 %v2166_v52 }
0x12fb   :  { %vm789_vm14 = vmor %vm787_vm13, %vm788_vm12 }
0x12fc   :  { %v784_v42 = vsub.f32 1.0, %v783_v53 }
0x12fe   :  { %v785_v54 = vmul.f32 %v2166_v52, %v784_v42 }
0x1300   :  { %v786_v55 = vadd.f32 %v2166_v52, %v785_v54  ;;  %v574_v54 = vpop.f32.mrf.mxu0 }
0x1302   :  { %v790_v11 = vsel %vm789_vm14, %v2166_v52, %v786_v55  ;;  %v575_v55 = vadd.f32 %v574_v54, %v541_v26  ;;  %v2060_v54 = vld [vmem:[%s2854_s3 + $0x28] sm:$0x1] }
0x1303   :  { %v795_v60 = vsel %vm792_vm15, %v794_v58, %v790_v11  ;;  %2061 = vmatpush.msk.msra.mxu0 %vm71_vm0, %v2060_v54 }
0x1304   :  { %v803_v63 = vmul.f32 %v801_v62, %v795_v60 }
0x1361   :  { %v806_v59 = vpop.permute.xlu0 %805 }
0x1362   :  { %v808_v61 = vmul.f32 %v806_v59, %v795_v60 }
0x1364   :  { %810 = vrot.lane.b32.xlu2 %v808_v61, %s2302_s26 }
0x13be   :  { %v811_v0 = vpop.permute.xlu2 %810 }
0x13bf   :  { %v813_v1 = vadd.f32 %v811_v0, %v803_v63 }
0x13c1   :  { %2167 = vtanh.f32 %v813_v1  ;;  %v834_v3 = vrot.slane %v813_v1, 4 }
0x13c7   :  { %v2168_v2 = vpop.eup %2167 }
0x13c8   :  { %816 = vrot.lane.b32.xlu0 %v2168_v2, %s2301_s25 }
0x13d0   :  { %835 = vrot.lane.b32.xlu0 %v834_v3, %s2304_s28 }
0x143a   :  { %v817_v4 = vpop.permute.xlu0 %816 }
0x143b   :  { %v819_v5 = vmul.f32 %v817_v4, %v795_v60 }
0x143d   :  { %v827_v6 = vrot.slane %v819_v5, 4 }
0x143f   :  { %828 = vrot.lane.b32.xlu2 %v827_v6, %s2302_s26 }
0x1442   :  { %v836_v14 = vpop.permute.xlu0 %835 }
0x1443   :  { %v840_v15 = vsel %vm825_vm2, %v836_v14, %v838_v12 }
0x1444   :  { %v889_v13 = vrot.slane %v840_v15, 2  ;;  %v923_v48 = vrot.slane %v840_v15, 6 }
0x1447   :  { %890 = vrot.lane.b32.xlu2 %v889_v13, %s2302_s26 }
0x1499   :  { %v829_v16 = vpop.permute.xlu2 %828 }
0x149a   :  { %v832_v17 = vsel %vm825_vm2, %v829_v16, %v751_v45 }
0x149b   :  { %2053 = vmatmul.msk.f32.vlgmr.msrb.gmra.mxu1 %vm98_vm7, %v832_v17  ;;  %v915_v51 = vrot.slane %v832_v17, 6 }
0x14a1   :  { %v891_v37 = vpop.permute.xlu2 %890 }
0x1518   :  { %v861_v18 = vpop.f32.mrf.mxu1 }
0x1519   :  { %v865_v19 = vrot.slane %v861_v18, 2 }
0x151b   :  { %v867_v20 = vadd.f32 %v865_v19, %v2507_v27 }
0x151d   :  { %2169 = vtanh.f32 %v867_v20  ;;  %v2054_v22 = vmul.f32 -1.442695, %v867_v20 }
0x151f   :  { %2171 = vpow2.f32 %v2054_v22 }
0x1523   :  { %v2170_v21 = vpop.eup %2169 }
0x1524   :  { %895 = vrot.lane.b32.xlu1 %v2170_v21, %s2301_s25 }
0x1525   :  { %v2172_v23 = vpop.eup %2171 }
0x1526   :  { %v871_v24 = vadd.f32 1.0, %v2172_v23 }
0x1528   :  { %2173 = vrcp.f32 %v871_v24  ;;  %v883_v31 = vand.u32 2147483648, %v871_v24  ;;  %vm877_vm4 = vweird.f32 %v871_v24  ;;  %v881_v32 = vand.u32 2147483647, %v871_v24 }
0x152a   :  { %v884_v33 = vor.u32 1.1754944e-38, %v883_v31  ;;  %vm882_vm8 = vcmp.eq.f32.partialorder %v881_v32, 8.507059e+37 }
0x152e   :  { %v2174_v25 = vpop.eup %2173 }
0x152f   :  { %v873_v9 = vmul.f32 %v2174_v25, %v871_v24  ;;  %vm878_vm3 = vweird.f32 %v2174_v25 }
0x1530   :  { %vm879_vm5 = vmor %vm877_vm4, %vm878_vm3 }
0x1531   :  { %v874_v28 = vsub.f32 1.0, %v873_v9 }
0x1533   :  { %v875_v29 = vmul.f32 %v2174_v25, %v874_v28 }
0x1535   :  { %v876_v30 = vadd.f32 %v2174_v25, %v875_v29 }
0x1537   :  { %v880_v27 = vsel %vm879_vm5, %v2174_v25, %v876_v30 }
0x1538   :  { %v885_v35 = vsel %vm882_vm8, %v884_v33, %v880_v27 }
0x1539   :  { %v893_v39 = vmul.f32 %v891_v37, %v885_v35 }
0x1596   :  { %v896_v34 = vpop.permute.xlu1 %895 }
0x1597   :  { %v898_v36 = vmul.f32 %v896_v34, %v885_v35 }
0x1599   :  { %900 = vrot.lane.b32.xlu0 %v898_v36, %s2302_s26 }
0x160b   :  { %v901_v40 = vpop.permute.xlu0 %900 }
0x160c   :  { %v903_v41 = vadd.f32 %v901_v40, %v893_v39 }
0x160e   :  { %2175 = vtanh.f32 %v903_v41  ;;  %v919_v43 = vrot.slane %v903_v41, 4 }
0x1610   :  { %920 = vrot.lane.b32.xlu0 %v919_v43, %s2304_s28 }
0x1614   :  { %v2176_v44 = vpop.eup %2175 }
0x1615   :  { %906 = vrot.lane.b32.xlu1 %v2176_v44, %s2301_s25 }
0x1682   :  { %v921_v47 = vpop.permute.xlu0 %920 }
0x1683   :  { %v925_v49 = vsel %vm825_vm2, %v921_v47, %v923_v48 }
0x1684   :  { %v972_v50 = vrot.slane %v925_v49, 2  ;;  %v1006_v22 = vrot.slane %v925_v49, 6 }
0x1687   :  { %v907_v45 = vpop.permute.xlu1 %906 }
0x1688   :  { %v909_v38 = vmul.f32 %v907_v45, %v885_v35 }
0x168a   :  { %v911_v46 = vrot.slane %v909_v38, 4 }
0x168c   :  { %912 = vrot.lane.b32.xlu2 %v911_v46, %s2302_s26 }
0x1694   :  { %973 = vrot.lane.b32.xlu2 %v972_v50, %s2302_s26 }
0x16e6   :  { %v913_v52 = vpop.permute.xlu2 %912 }
0x16e7   :  { %v917_v53 = vsel %vm825_vm2, %v913_v52, %v915_v51 }
0x16e8   :  { %v927_v42 = vrot.slane %v917_v53, 2  ;;  %v998_v25 = vrot.slane %v917_v53, 6 }
0x16ea   :  { %2055 = vmatmul.msk.f32.vlgmr.msrb.gmra.mxu2 %vm98_vm7, %v927_v42 }
0x16ee   :  { %v974_v12 = vpop.permute.xlu2 %973 }
0x176d   :  { %v947_v56 = vpop.f32.mrf.mxu2 }
0x176e   :  { %v950_v57 = vadd.f32 %v947_v56, %v575_v55  ;;  %v44_v56 = vld [vmem:[%s2856_s5 + $0x58] sm:$0xff] }
0x176f   :  { %1147 = vmatpush.msra.mxu1 %v44_v56  ;;  %1226 = vmatpush.msra.mxu2 %v44_v56 }
0x1770   :  { %2177 = vtanh.f32 %v950_v57  ;;  %v2056_v58 = vmul.f32 -1.442695, %v950_v57  ;;  %v43_v57 = vld [vmem:[%s2856_s5 + $0x50] sm:$0xff]  ;;  %1300 = vmatpush.msra.mxu3 %v44_v56 }
0x1771   :  { %1148 = vmatpush.msra.mxu1 %v43_v57  ;;  %1227 = vmatpush.msra.mxu2 %v43_v57 }
0x1772   :  { %2179 = vpow2.f32 %v2056_v58  ;;  %1301 = vmatpush.msra.mxu3 %v43_v57 }
0x1776   :  { %v2178_v11 = vpop.eup %2177 }
0x1777   :  { %978 = vrot.lane.b32.xlu1 %v2178_v11, %s2301_s25  ;;  %v42_v11 = vld [vmem:[%s2856_s5 + $0x48] sm:$0xff] }
0x1778   :  { %v2180_v59 = vpop.eup %2179  ;;  %1149 = vmatpush.msra.mxu1 %v42_v11  ;;  %1228 = vmatpush.msra.mxu2 %v42_v11 }
0x1779   :  { %v954_v60 = vadd.f32 1.0, %v2180_v59  ;;  %1302 = vmatpush.msra.mxu3 %v42_v11 }
0x177b   :  { %2181 = vrcp.f32 %v954_v60  ;;  %v966_v2 = vand.u32 2147483648, %v954_v60  ;;  %vm960_vm10 = vweird.f32 %v954_v60  ;;  %v964_v8 = vand.u32 2147483647, %v954_v60 }
0x177d   :  { %v967_v3 = vor.u32 1.1754944e-38, %v966_v2  ;;  %vm965_vm6 = vcmp.eq.f32.partialorder %v964_v8, 8.507059e+37  ;;  %v53_v2 = vld [vmem:[%s2851_s0 + $0x18] sm:$0xff]  ;;  %v41_v8 = vld [vmem:[%s2856_s5 + $0x40] sm:$0xff] }
0x177e   :  { %1150 = vmatpush.msra.mxu1 %v41_v8  ;;  %1229 = vmatpush.msra.mxu2 %v41_v8 }
0x177f   :  { %1303 = vmatpush.msra.mxu3 %v41_v8 }
0x1780   :  { %1374 = vmatpush.msrb.mxu1 %v44_v56  ;;  %1448 = vmatpush.msrb.mxu2 %v44_v56 }
0x1781   :  { %v2182_v61 = vpop.eup %2181 }
0x1782   :  { %v956_v62 = vmul.f32 %v2182_v61, %v954_v60  ;;  %vm961_vm9 = vweird.f32 %v2182_v61  ;;  %1375 = vmatpush.msrb.mxu1 %v43_v57  ;;  %1449 = vmatpush.msrb.mxu2 %v43_v57 }
0x1783   :  { %vm962_vm11 = vmor %vm960_vm10, %vm961_vm9 }
0x1784   :  { %v957_v63 = vsub.f32 1.0, %v956_v62  ;;  %1376 = vmatpush.msrb.mxu1 %v42_v11  ;;  %1450 = vmatpush.msrb.mxu2 %v42_v11 }
0x1786   :  { %v958_v0 = vmul.f32 %v2182_v61, %v957_v63  ;;  %1377 = vmatpush.msrb.mxu1 %v41_v8  ;;  %1451 = vmatpush.msrb.mxu2 %v41_v8 }
0x1788   :  { %v959_v1 = vadd.f32 %v2182_v61, %v958_v0 }
0x178a   :  { %v963_v26 = vsel %vm962_vm11, %v2182_v61, %v959_v1  ;;  %v58_v1 = vld [vmem:[%s2853_s2 + $0x18] sm:$0xff] }
0x178b   :  { %v968_v5 = vsel %vm965_vm6, %v967_v3, %v963_v26 }
0x178c   :  { %v976_v14 = vmul.f32 %v974_v12, %v968_v5 }
0x17e9   :  { %v979_v4 = vpop.permute.xlu1 %978 }
0x17ea   :  { %v981_v6 = vmul.f32 %v979_v4, %v968_v5 }
0x17ec   :  { %983 = vrot.lane.b32.xlu0 %v981_v6, %s2302_s26  ;;  %v2631_v6 = vld [vmem:[%s2857_s6] sm:$0xf] }
0x17ed   :  { %v1098_v12 = vperm.slane %v2631_v6, 2 }
0x185e   :  { %v984_v15 = vpop.permute.xlu0 %983 }
0x185f   :  { %v986_v13 = vadd.f32 %v984_v15, %v976_v14 }
0x1861   :  { %2183 = vtanh.f32 %v986_v13  ;;  %v1002_v16 = vrot.slane %v986_v13, 4 }
0x1863   :  { %1003 = vrot.lane.b32.xlu0 %v1002_v16, %s2304_s28 }
0x1867   :  { %v2184_v17 = vpop.eup %2183 }
0x1868   :  { %989 = vrot.lane.b32.xlu1 %v2184_v17, %s2301_s25 }
0x18d5   :  { %v1004_v21 = vpop.permute.xlu0 %1003 }
0x18d6   :  { %v2579_v23 = vsel %vm825_vm2, %v1004_v21, %v1006_v22 }
0x18d7   :  { %v1058_v24 = vrot.slane %v2579_v23, 2  ;;  %v1092_v62 = vrot.slane %v2579_v23, 6 }
0x18da   :  { %v990_v18 = vpop.permute.xlu1 %989 }
0x18db   :  { %v992_v19 = vmul.f32 %v990_v18, %v968_v5 }
0x18dd   :  { %v994_v20 = vrot.slane %v992_v19, 4 }
0x18df   :  { %995 = vrot.lane.b32.xlu2 %v994_v20, %s2302_s26 }
0x18e7   :  { %1059 = vrot.lane.b32.xlu2 %v1058_v24, %s2302_s26 }
0x1939   :  { %v996_v9 = vpop.permute.xlu2 %995 }
0x193a   :  { %v2585_v28 = vsel %vm825_vm2, %v996_v9, %v998_v25 }
0x193b   :  { %v1010_v29 = vrot.slane %v2585_v28, 4  ;;  %v1084_v26 = vrot.slane %v2585_v28, 6 }
0x193d   :  { %2057 = vmatmul.msk.f32.vlgmr.msrb.gmra.mxu3 %vm98_vm7, %v1010_v29 }
0x193e   :  { %1523 = vmatpush.msrb.mxu3 %v44_v56 }
0x1940   :  { %1524 = vmatpush.msrb.mxu3 %v43_v57 }
0x1941   :  { %v1060_v49 = vpop.permute.xlu2 %1059 }
0x1942   :  { %1525 = vmatpush.msrb.mxu3 %v42_v11 }
0x1944   :  { %1526 = vmatpush.msrb.mxu3 %v41_v8 }
0x19c0   :  { %v1030_v30 = vpop.f32.mrf.mxu3 }
0x19c1   :  { %v1034_v31 = vrot.slane %v1030_v30, 6 }
0x19c3   :  { %v1036_v32 = vadd.f32 %v1034_v31, %v575_v55  ;;  %v2059_v55 = vld [vmem:[%s2854_s3 + $0x20] sm:$0xff] }
0x19c4   :  { %1123 = vmatpush.msra.mxu0 %v2059_v55 }
0x19c5   :  { %2185 = vtanh.f32 %v1036_v32  ;;  %v2058_v33 = vmul.f32 -1.442695, %v1036_v32  ;;  %2062 = vmatmul.msk.f32.vlgmr.msra.gmra.mxu0 %vm64_vm1, %v53_v2 }
0x19c7   :  { %2187 = vpow2.f32 %v2058_v33 }
0x19cb   :  { %v2186_v27 = vpop.eup %2185 }
0x19cc   :  { %1064 = vrot.lane.b32.xlu1 %v2186_v27, %s2301_s25 }
0x19cd   :  { %v2188_v34 = vpop.eup %2187 }
0x19ce   :  { %v1040_v35 = vadd.f32 1.0, %v2188_v34 }
0x19d0   :  { %2189 = vrcp.f32 %v1040_v35  ;;  %v1052_v43 = vand.u32 2147483648, %v1040_v35  ;;  %vm1046_vm13 = vweird.f32 %v1040_v35  ;;  %v1050_v44 = vand.u32 2147483647, %v1040_v35 }
0x19d2   :  { %v1053_v38 = vor.u32 1.1754944e-38, %v1052_v43  ;;  %vm1051_vm15 = vcmp.eq.f32.partialorder %v1050_v44, 8.507059e+37 }
0x19d6   :  { %v2190_v36 = vpop.eup %2189 }
0x19d7   :  { %v1042_v37 = vmul.f32 %v2190_v36, %v1040_v35  ;;  %vm1047_vm12 = vweird.f32 %v2190_v36 }
0x19d8   :  { %vm1048_vm14 = vmor %vm1046_vm13, %vm1047_vm12 }
0x19d9   :  { %v1043_v39 = vsub.f32 1.0, %v1042_v37 }
0x19db   :  { %v1044_v40 = vmul.f32 %v2190_v36, %v1043_v39 }
0x19dd   :  { %v1045_v41 = vadd.f32 %v2190_v36, %v1044_v40 }
0x19df   :  { %v1049_v45 = vsel %vm1048_vm14, %v2190_v36, %v1045_v41 }
0x19e0   :  { %v1054_v47 = vsel %vm1051_vm15, %v1053_v38, %v1049_v45 }
0x19e1   :  { %v1062_v50 = vmul.f32 %v1060_v49, %v1054_v47 }
0x1a3e   :  { %v1065_v46 = vpop.permute.xlu1 %1064 }
0x1a3f   :  { %v1067_v48 = vmul.f32 %v1065_v46, %v1054_v47 }
0x1a41   :  { %1069 = vrot.lane.b32.xlu0 %v1067_v48, %s2302_s26 }
0x1a42   :  { %v1125_v14 = vpop.f32.mrf.mxu0 }
0x1a43   :  { %v2636_v15 = vadd.f32 %v1125_v14, %v1098_v12 }
0x1ab3   :  { %v1070_v51 = vpop.permute.xlu0 %1069 }
0x1ab4   :  { %v1072_v52 = vadd.f32 %v1070_v51, %v1062_v50 }
0x1ab6   :  { %2191 = vtanh.f32 %v1072_v52  ;;  %v1088_v53 = vrot.slane %v1072_v52, 4 }
0x1ab8   :  { %1089 = vrot.lane.b32.xlu0 %v1088_v53, %s2304_s28 }
0x1abc   :  { %v2192_v42 = vpop.eup %2191 }
0x1abd   :  { %1075 = vrot.lane.b32.xlu1 %v2192_v42, %s2301_s25 }
0x1b2a   :  { %v1090_v61 = vpop.permute.xlu0 %1089 }
0x1b2b   :  { %v1094_v63 = vsel %vm825_vm2, %v1090_v61, %v1092_v62 }
0x1b2c   :  { %v1177_v0 = vrot.slane %v1094_v63, 6 }
0x1b2f   :  { %v1076_v58 = vpop.permute.xlu1 %1075 }
0x1b30   :  { %v1078_v59 = vmul.f32 %v1076_v58, %v1054_v47 }
0x1b32   :  { %v1080_v60 = vrot.slane %v1078_v59, 4 }
0x1b34   :  { %1081 = vrot.lane.b32.xlu2 %v1080_v60, %s2302_s26 }
0x1b3c   :  { %1178 = vrot.lane.b32.xlu2 %v1177_v0, %s2302_s26 }
0x1b44   :  { %1200 = vperm.xlu2 %2095, %v58_v1  }
0x1b8e   :  { %v1082_v3 = vpop.permute.xlu2 %1081 }
0x1b8f   :  { %v1086_v4 = vsel %vm825_vm2, %v1082_v3, %v1084_v26 }
0x1b90   :  { %v1132_v5 = vrot.slane %v1086_v4, 6 }
0x1b92   :  { %2064 = vmatmul.msk.f32.vlgmr.msra.gmra.mxu1 %vm98_vm7, %v1132_v5 }
0x1b96   :  { %v1179_v27 = vpop.permute.xlu2 %1178 }
0x1b9e   :  { %v2643_v37 = vpop.permute.xlu2 %1200 }
0x1b9f   :  { %vm1203_vm5 = vcmp.gt.f32.partialorder %v2643_v37, 0.0 }
0x1c0f   :  { %v1152_v13 = vpop.f32.mrf.mxu1 }
0x1c10   :  { %v1155_v16 = vadd.f32 %v1152_v13, %v2636_v15 }
0x1c12   :  { %2193 = vtanh.f32 %v1155_v16  ;;  %v2065_v17 = vmul.f32 -1.442695, %v1155_v16 }
0x1c14   :  { %2195 = vpow2.f32 %v2065_v17 }
0x1c18   :  { %v2194_v10 = vpop.eup %2193 }
0x1c19   :  { %1183 = vrot.lane.b32.xlu1 %v2194_v10, %s2301_s25 }
0x1c1a   :  { %v2196_v18 = vpop.eup %2195 }
0x1c1b   :  { %v1159_v19 = vadd.f32 1.0, %v2196_v18 }
0x1c1d   :  { %2197 = vrcp.f32 %v1159_v19  ;;  %v1171_v25 = vand.u32 2147483648, %v1159_v19  ;;  %vm1165_vm2 = vweird.f32 %v1159_v19  ;;  %v1169_v9 = vand.u32 2147483647, %v1159_v19 }
0x1c1f   :  { %v1172_v29 = vor.u32 1.1754944e-38, %v1171_v25  ;;  %vm1170_vm4 = vcmp.eq.f32.partialorder %v1169_v9, 8.507059e+37 }
0x1c23   :  { %v2198_v20 = vpop.eup %2197 }
0x1c24   :  { %v1161_v21 = vmul.f32 %v2198_v20, %v1159_v19  ;;  %vm1166_vm0 = vweird.f32 %v2198_v20 }
0x1c25   :  { %vm1167_vm3 = vmor %vm1165_vm2, %vm1166_vm0 }
0x1c26   :  { %v1162_v22 = vsub.f32 1.0, %v1161_v21 }
0x1c28   :  { %v1163_v23 = vmul.f32 %v2198_v20, %v1162_v22 }
0x1c2a   :  { %v1164_v24 = vadd.f32 %v2198_v20, %v1163_v23 }
0x1c2c   :  { %v1168_v28 = vsel %vm1167_vm3, %v2198_v20, %v1164_v24 }
0x1c2d   :  { %v1173_v31 = vsel %vm1170_vm4, %v1172_v29, %v1168_v28 }
0x1c2e   :  { %v1181_v33 = vmul.f32 %v1179_v27, %v1173_v31 }
0x1c8b   :  { %v1184_v30 = vpop.permute.xlu1 %1183 }
0x1c8c   :  { %v1186_v32 = vmul.f32 %v1184_v30, %v1173_v31 }
0x1c8e   :  { %1188 = vrot.lane.b32.xlu0 %v1186_v32, %s2302_s26 }
0x1c96   :  { %1204 = vrot.lane.b32.xlu0 %v1132_v5, %s2304_s28 }
0x1d00   :  { %v1189_v34 = vpop.permute.xlu0 %1188 }
0x1d01   :  { %v1191_v35 = vadd.f32 %v1189_v34, %v1181_v33 }
0x1d03   :  { %2199 = vtanh.f32 %v1191_v35  ;;  %v1208_v61 = vsel %vm1203_vm5, %v1191_v35, %v1179_v27 }
0x1d04   :  { %v1259_v62 = vrot.slane %v1208_v61, 6 }
0x1d08   :  { %v1205_v41 = vpop.permute.xlu0 %1204 }
0x1d09   :  { %v2200_v36 = vpop.eup %2199 }
0x1d0a   :  { %1194 = vrot.lane.b32.xlu1 %v2200_v36, %s2301_s25 }
0x1d7c   :  { %v1195_v39 = vpop.permute.xlu1 %1194 }
0x1d7d   :  { %v1197_v40 = vmul.f32 %v1195_v39, %v1173_v31 }
0x1d7f   :  { %v1207_v43 = vsel %vm1203_vm5, %v1197_v40, %v1205_v41 }
0x1d80   :  { %1210 = vrot.lane.b32.xlu1 %v1207_v43, %s2302_s26  ;;  %v1278_v26 = vrot.slane %v1207_v43, 6 }
0x1df2   :  { %v1211_v44 = vpop.permute.xlu1 %1210 }
0x1df3   :  { %2066 = vmatmul.msk.f32.vlgmr.msra.gmra.mxu2 %vm98_vm7, %v1211_v44 }
0x1e76   :  { %v1231_v45 = vpop.f32.mrf.mxu2 }
0x1e77   :  { %v1235_v38 = vrot.slane %v1231_v45, 6 }
0x1e79   :  { %v1237_v46 = vadd.f32 %v1235_v38, %v2636_v15 }
0x1e7b   :  { %2201 = vtanh.f32 %v1237_v46  ;;  %v2067_v48 = vmul.f32 -1.442695, %v1237_v46 }
0x1e7d   :  { %2203 = vpow2.f32 %v2067_v48 }
0x1e81   :  { %v2202_v47 = vpop.eup %2201 }
0x1e82   :  { %1263 = vrot.lane.b32.xlu2 %v2202_v47, %s2301_s25 }
0x1e83   :  { %v2204_v49 = vpop.eup %2203 }
0x1e84   :  { %v1241_v50 = vadd.f32 1.0, %v2204_v49 }
0x1e86   :  { %2205 = vrcp.f32 %v1241_v50  ;;  %v1253_v55 = vand.u32 2147483648, %v1241_v50  ;;  %vm1247_vm9 = vweird.f32 %v1241_v50  ;;  %v1251_v56 = vand.u32 2147483647, %v1241_v50 }
0x1e88   :  { %v1254_v11 = vor.u32 1.1754944e-38, %v1253_v55  ;;  %vm1252_vm11 = vcmp.eq.f32.partialorder %v1251_v56, 8.507059e+37 }
0x1e8c   :  { %v2206_v51 = vpop.eup %2205 }
0x1e8d   :  { %v1243_v52 = vmul.f32 %v2206_v51, %v1241_v50  ;;  %vm1248_vm8 = vweird.f32 %v2206_v51 }
0x1e8e   :  { %vm1249_vm10 = vmor %vm1247_vm9, %vm1248_vm8 }
0x1e8f   :  { %v1244_v53 = vsub.f32 1.0, %v1243_v52 }
0x1e91   :  { %v1245_v42 = vmul.f32 %v2206_v51, %v1244_v53 }
0x1e93   :  { %v1246_v54 = vadd.f32 %v2206_v51, %v1245_v42 }
0x1e95   :  { %v1250_v57 = vsel %vm1249_vm10, %v2206_v51, %v1246_v54  ;;  %vm1590_vm10 = vcmask 130048  }
0x1e96   :  { %v1255_v59 = vsel %vm1252_vm11, %v1254_v11, %v1250_v57 }
0x1e97   :  { %v1261_v63 = vmul.f32 %v1259_v62, %v1255_v59 }
0x1edc   :  { %v1264_v58 = vpop.permute.xlu2 %1263 }
0x1edd   :  { %v1266_v60 = vmul.f32 %v1264_v58, %v1255_v59 }
0x1edf   :  { %1268 = vrot.lane.b32.xlu0 %v1266_v60, %s2302_s26 }
0x1f51   :  { %v1269_v0 = vpop.permute.xlu0 %1268 }
0x1f52   :  { %v1271_v1 = vadd.f32 %v1269_v0, %v1261_v63 }
0x1f54   :  { %2207 = vtanh.f32 %v1271_v1  ;;  %v1281_v33 = vsel %vm1203_vm5, %v1271_v1, %v1259_v62 }
0x1f55   :  { %v1333_v34 = vrot.slane %v1281_v33, 6 }
0x1f5a   :  { %v2208_v2 = vpop.eup %2207 }
0x1f5b   :  { %1274 = vrot.lane.b32.xlu1 %v2208_v2, %s2301_s25 }
0x1fcd   :  { %v1275_v8 = vpop.permute.xlu1 %1274 }
0x1fce   :  { %v1277_v3 = vmul.f32 %v1275_v8, %v1255_v59 }
0x1fd0   :  { %v1280_v4 = vsel %vm1203_vm5, %v1277_v3, %v1278_v26 }
0x1fd1   :  { %v1283_v5 = vrot.slane %v1280_v4, 2  ;;  %v1352_v43 = vrot.slane %v1280_v4, 6 }
0x1fd3   :  { %1284 = vrot.lane.b32.xlu2 %v1283_v5, %s2302_s26 }
0x202d   :  { %v1285_v14 = vpop.permute.xlu2 %1284 }
0x202e   :  { %2068 = vmatmul.msk.f32.vlgmr.msra.gmra.mxu3 %vm98_vm7, %v1285_v14 }
0x20b1   :  { %v1305_v13 = vpop.f32.mrf.mxu3 }
0x20b2   :  { %v1309_v16 = vrot.slane %v1305_v13, 4 }
0x20b4   :  { %v1311_v10 = vadd.f32 %v1309_v16, %v2636_v15  ;;  %v54_v16 = vld [vmem:[%s2851_s0 + $0x20] sm:$0xf] }
0x20b5   :  { %2063 = vmatmul.msk.f32.gmra.mxu0 %vm64_vm1, %v54_v16 }
0x20b6   :  { %2209 = vtanh.f32 %v1311_v10  ;;  %v2069_v18 = vmul.f32 -1.442695, %v1311_v10 }
0x20b8   :  { %2211 = vpow2.f32 %v2069_v18 }
0x20bc   :  { %v2210_v17 = vpop.eup %2209 }
0x20bd   :  { %1337 = vrot.lane.b32.xlu0 %v2210_v17, %s2301_s25 }
0x20be   :  { %v2212_v19 = vpop.eup %2211 }
0x20bf   :  { %v1315_v20 = vadd.f32 1.0, %v2212_v19 }
0x20c1   :  { %2213 = vrcp.f32 %v1315_v20  ;;  %v1327_v9 = vand.u32 2147483648, %v1315_v20  ;;  %vm1321_vm12 = vweird.f32 %v1315_v20  ;;  %v1325_v28 = vand.u32 2147483647, %v1315_v20 }
0x20c3   :  { %v1328_v30 = vor.u32 1.1754944e-38, %v1327_v9  ;;  %vm1326_vm14 = vcmp.eq.f32.partialorder %v1325_v28, 8.507059e+37  ;;  %v1589_v9 = vld [vmem:[%s2858_s7 + $0x8] sm:$0xff] }
0x20c4   :  { %1608 = vmatpush.msrb.mxu0 %v1589_v9 }
0x20c7   :  { %v2214_v21 = vpop.eup %2213 }
0x20c8   :  { %v1317_v22 = vmul.f32 %v2214_v21, %v1315_v20  ;;  %vm1322_vm6 = vweird.f32 %v2214_v21 }
0x20c9   :  { %vm1323_vm13 = vmor %vm1321_vm12, %vm1322_vm6 }
0x20ca   :  { %v1318_v23 = vsub.f32 1.0, %v1317_v22  ;;  %v59_v22 = vld [vmem:[%s2853_s2 + $0x20] sm:$0xff] }
0x20cc   :  { %v1319_v24 = vmul.f32 %v2214_v21, %v1318_v23  ;;  %v1579_v23 = vld [vmem:[%s2852_s1] sm:$0xff]  ;;  %s2305_s1 = smov [#allocation2]  }
0x20ce   :  { %v1320_v25 = vadd.f32 %v2214_v21, %v1319_v24 }
0x20d0   :  { %v1324_v29 = vsel %vm1323_vm13, %v2214_v21, %v1320_v25 }
0x20d1   :  { %v1329_v32 = vsel %vm1326_vm14, %v1328_v30, %v1324_v29 }
0x20d2   :  { %v1335_v35 = vmul.f32 %v1333_v34, %v1329_v32 }
0x212f   :  { %v1338_v31 = vpop.permute.xlu0 %1337 }
0x2130   :  { %v1340_v27 = vmul.f32 %v1338_v31, %v1329_v32  ;;  %v1588_v31 = vld [vmem:[%s2858_s7] sm:$0xff]  ;;  %s2017_s7 = sshll.u32 %s2305_s1, 4  ;;  %s2018_s7 = int_to_ptr.vmem [resolvable:$true] %s2017_s7 }
0x2131   :  { %1609 = vmatpush.msrb.mxu0 %v1588_v31 }
0x2132   :  { %1342 = vrot.lane.b32.xlu1 %v1340_v27, %s2302_s26  ;;  %v1128_v17 = vpop.f32.mrf.mxu0 }
0x2133   :  { %v2699_v18 = vadd.f32 %v1128_v17, %v1098_v12 }
0x21a4   :  { %v1343_v36 = vpop.permute.xlu1 %1342 }
0x21a5   :  { %v1345_v39 = vadd.f32 %v1343_v36, %v1335_v35 }
0x21a7   :  { %2215 = vtanh.f32 %v1345_v39  ;;  %v2675_v63 = vsel %vm1203_vm5, %v1345_v39, %v1333_v34 }
0x21a8   :  { %v1407_v0 = vrot.slane %v2675_v63, 6 }
0x21ad   :  { %v2216_v40 = vpop.eup %2215 }
0x21ae   :  { %1348 = vrot.lane.b32.xlu2 %v2216_v40, %s2301_s25 }
0x2208   :  { %v1349_v41 = vpop.permute.xlu2 %1348 }
0x2209   :  { %v1351_v44 = vmul.f32 %v1349_v41, %v1329_v32 }
0x220b   :  { %v1354_v45 = vsel %vm1203_vm5, %v1351_v44, %v1352_v43  ;;  %v1580_v44 = vlaneseq }
0x220c   :  { %v1357_v38 = vrot.slane %v1354_v45, 4  ;;  %v1426_v4 = vrot.slane %v1354_v45, 6 }
0x220d   :  { %v1581_v45 = vand.u32 127, %v1580_v44 }
0x220e   :  { %1358 = vrot.lane.b32.xlu0 %v1357_v38, %s2302_s26 }
0x2280   :  { %v1359_v46 = vpop.permute.xlu0 %1358 }
0x2281   :  { %2070 = vmatmul.msk.f32.vlgmr.msrb.gmra.mxu1 %vm98_vm7, %v1359_v46 }
0x22fe   :  { %v1379_v47 = vpop.f32.mrf.mxu1 }
0x22ff   :  { %v1383_v48 = vrot.slane %v1379_v47, 2  ;;  %v1617_v47 = vld [vmem:[%s2855_s4 + $0x18] sm:$0xff] }
0x2300   :  { %1634 = vmatpush.msra.mxu1 %v1617_v47 }
0x2301   :  { %v1385_v49 = vadd.f32 %v1383_v48, %v2636_v15  ;;  %v1616_v48 = vld [vmem:[%s2855_s4 + $0x10] sm:$0xff] }
0x2302   :  { %1635 = vmatpush.msra.mxu1 %v1616_v48 }
0x2303   :  { %2217 = vtanh.f32 %v1385_v49  ;;  %v2071_v51 = vmul.f32 -1.442695, %v1385_v49  ;;  %v1615_v49 = vld [vmem:[%s2855_s4 + $0x8] sm:$0xff] }
0x2304   :  { %1636 = vmatpush.msra.mxu1 %v1615_v49 }
0x2305   :  { %2219 = vpow2.f32 %v2071_v51 }
0x2309   :  { %v2218_v50 = vpop.eup %2217 }
0x230a   :  { %1411 = vrot.lane.b32.xlu1 %v2218_v50, %s2301_s25  ;;  %v1614_v50 = vld [vmem:[%s2855_s4] sm:$0xff] }
0x230b   :  { %v2220_v52 = vpop.eup %2219  ;;  %1637 = vmatpush.msra.mxu1 %v1614_v50 }
0x230c   :  { %v1389_v53 = vadd.f32 1.0, %v2220_v52 }
0x230e   :  { %2221 = vrcp.f32 %v1389_v53  ;;  %v1401_v11 = vand.u32 2147483648, %v1389_v53  ;;  %vm1395_vm0 = vweird.f32 %v1389_v53  ;;  %v1399_v58 = vand.u32 2147483647, %v1389_v53 }
0x2310   :  { %v1402_v59 = vor.u32 1.1754944e-38, %v1401_v11  ;;  %vm1400_vm3 = vcmp.eq.f32.partialorder %v1399_v58, 8.507059e+37 }
0x2314   :  { %v2222_v42 = vpop.eup %2221 }
0x2315   :  { %v1391_v54 = vmul.f32 %v2222_v42, %v1389_v53  ;;  %vm1396_vm15 = vweird.f32 %v2222_v42 }
0x2316   :  { %vm1397_vm2 = vmor %vm1395_vm0, %vm1396_vm15 }
0x2317   :  { %v1392_v55 = vsub.f32 1.0, %v1391_v54 }
0x2319   :  { %v1393_v56 = vmul.f32 %v2222_v42, %v1392_v55 }
0x231b   :  { %v1394_v57 = vadd.f32 %v2222_v42, %v1393_v56 }
0x231d   :  { %v1398_v15 = vsel %vm1397_vm2, %v2222_v42, %v1394_v57 }
0x231e   :  { %v1403_v61 = vsel %vm1400_vm3, %v1402_v59, %v1398_v15 }
0x231f   :  { %v1409_v1 = vmul.f32 %v1407_v0, %v1403_v61 }
0x237c   :  { %v1412_v60 = vpop.permute.xlu1 %1411 }
0x237d   :  { %v1414_v62 = vmul.f32 %v1412_v60, %v1403_v61 }
0x237f   :  { %1416 = vrot.lane.b32.xlu2 %v1414_v62, %s2302_s26 }
0x23d9   :  { %v1417_v2 = vpop.permute.xlu2 %1416 }
0x23da   :  { %v2680_v8 = vadd.f32 %v1417_v2, %v1409_v1 }
0x23dc   :  { %2223 = vtanh.f32 %v2680_v8 }
0x23e2   :  { %v2224_v26 = vpop.eup %2223 }
0x23e3   :  { %1422 = vrot.lane.b32.xlu0 %v2224_v26, %s2301_s25 }
0x2455   :  { %v1423_v3 = vpop.permute.xlu0 %1422 }
0x2456   :  { %v1425_v5 = vmul.f32 %v1423_v3, %v1403_v61 }
0x2458   :  { %v2686_v14 = vsel %vm1203_vm5, %v1425_v5, %v1426_v4 }
0x2459   :  { %v1431_v13 = vrot.slane %v2686_v14, 6 }
0x245b   :  { %1432 = vrot.lane.b32.xlu1 %v1431_v13, %s2302_s26 }
0x24cd   :  { %v1433_v10 = vpop.permute.xlu1 %1432 }
0x24ce   :  { %2072 = vmatmul.msk.f32.vlgmr.msrb.gmra.mxu2 %vm98_vm7, %v1433_v10 }
0x2551   :  { %v1453_v19 = vpop.f32.mrf.mxu2 }
0x2552   :  { %v1456_v20 = vadd.f32 %v1453_v19, %v2699_v18 }
0x2554   :  { %2225 = vtanh.f32 %v1456_v20  ;;  %v2073_v24 = vmul.f32 -1.442695, %v1456_v20 }
0x2556   :  { %2227 = vpow2.f32 %v2073_v24  ;;  %v47_v24 = vld [vmem:[%s2856_s5 + $0x70] sm:$0xff] }
0x255a   :  { %v2226_v21 = vpop.eup %2225 }
0x255b   :  { %1482 = vrot.lane.b32.xlu2 %v2226_v21, %s2301_s25 }
0x255c   :  { %v2228_v12 = vpop.eup %2227 }
0x255d   :  { %v1460_v25 = vadd.f32 1.0, %v2228_v12  ;;  %v46_v12 = vld [vmem:[%s2856_s5 + $0x68] sm:$0xff] }
0x255f   :  { %2229 = vrcp.f32 %v1460_v25  ;;  %v1472_v33 = vand.u32 2147483648, %v1460_v25  ;;  %vm1466_vm4 = vweird.f32 %v1460_v25  ;;  %v1470_v34 = vand.u32 2147483647, %v1460_v25 }
0x2561   :  { %v1473_v36 = vor.u32 1.1754944e-38, %v1472_v33  ;;  %vm1471_vm9 = vcmp.eq.f32.partialorder %v1470_v34, 8.507059e+37 }
0x2563   :  { %1499 = vperm.xlu2 %2095, %v59_v22  }
0x2565   :  { %v2230_v28 = vpop.eup %2229 }
0x2566   :  { %v1462_v29 = vmul.f32 %v2230_v28, %v1460_v25  ;;  %vm1467_vm1 = vweird.f32 %v2230_v28  ;;  %v45_v25 = vld [vmem:[%s2856_s5 + $0x60] sm:$0xff] }
0x2567   :  { %vm1468_vm8 = vmor %vm1466_vm4, %vm1467_vm1 }
0x2568   :  { %v1463_v30 = vsub.f32 1.0, %v1462_v29 }
0x256a   :  { %v1464_v32 = vmul.f32 %v2230_v28, %v1463_v30 }
0x256b   :  { %1583 = vperm.xlu2 %2095, %v1579_v23   ;;  %v48_v23 = vld [vmem:[%s2856_s5 + $0x78] sm:$0xff] }
0x256c   :  { %v1465_v27 = vadd.f32 %v2230_v28, %v1464_v32  ;;  %1660 = vmatpush.msra.mxu2 %v48_v23  ;;  %1745 = vmatpush.msra.mxu3 %v48_v23 }
0x256d   :  { %1831 = vmatpush.msra.mxu0 %v48_v23  ;;  %1921 = vmatpush.msrb.mxu1 %v48_v23 }
0x256e   :  { %v1469_v35 = vsel %vm1468_vm8, %v2230_v28, %v1465_v27  ;;  %1661 = vmatpush.msra.mxu2 %v47_v24  ;;  %1746 = vmatpush.msra.mxu3 %v47_v24  ;;  %v1618_v27 = vperm.slane %v2631_v6, 3 }
0x256f   :  { %v1474_v40 = vsel %vm1471_vm9, %v1473_v36, %v1469_v35  ;;  %1832 = vmatpush.msra.mxu0 %v47_v24  ;;  %1922 = vmatpush.msrb.mxu1 %v47_v24 }
0x2570   :  { %1662 = vmatpush.msra.mxu2 %v46_v12  ;;  %1747 = vmatpush.msra.mxu3 %v46_v12 }
0x2571   :  { %1833 = vmatpush.msra.mxu0 %v46_v12  ;;  %1923 = vmatpush.msrb.mxu1 %v46_v12 }
0x2572   :  { %1663 = vmatpush.msra.mxu2 %v45_v25  ;;  %1748 = vmatpush.msra.mxu3 %v45_v25 }
0x2573   :  { %1834 = vmatpush.msra.mxu0 %v45_v25  ;;  %1924 = vmatpush.msrb.mxu1 %v45_v25 }
0x25b5   :  { %v1483_v39 = vpop.permute.xlu2 %1482 }
0x25b6   :  { %v1485_v41 = vmul.f32 %v1483_v39, %v1474_v40 }
0x25b8   :  { %1487 = vrot.lane.b32.xlu0 %v1485_v41, %s2302_s26 }
0x25bd   :  { %v2716_v43 = vpop.permute.xlu2 %1499 }
0x25c5   :  { %v1584_v38 = vpop.permute.xlu2 %1583 }
0x25c6   :  { %vm1585_vm11 = vcmp.eq.s32.totalorder %v1581_v45, %v1584_v38 }
0x25c7   :  { %v2076_v46 = vsel %vm1585_vm11, 1.0, %v2300_v7  ;;  %v1429_v7 = vsel %vm1203_vm5, %v2680_v8, %v1407_v0  ;;  %vm1502_vm5 = vcmp.gt.f32.partialorder %v2716_v43, 0.0 }
0x25c8   :  { %2077 = vmatmul.msk.f32.vlgmr.msrb.gmra.mxu0 %vm1590_vm10, %v2076_v46  ;;  %v1478_v51 = vrot.slane %v1429_v7, 6 }
0x25ca   :  { %v1480_v52 = vmul.f32 %v1478_v51, %v1474_v40 }
0x262a   :  { %v1488_v53 = vpop.permute.xlu0 %1487 }
0x262b   :  { %v1490_v42 = vadd.f32 %v1488_v53, %v1480_v52 }
0x262d   :  { %2231 = vtanh.f32 %v1490_v42  ;;  %v2753_v17 = vsel %vm1502_vm5, %v1490_v42, %v1478_v51 }
0x2633   :  { %v2232_v54 = vpop.eup %2231 }
0x2634   :  { %1493 = vrot.lane.b32.xlu1 %v2232_v54, %s2301_s25 }
0x2645   :  { %v1611_v55 = vpop.f32.mrf.mxu0 }
0x2646   :  { %2078 = vmatmul.msk.f32.vlgmr.msra.gmra.mxu1 %vm98_vm7, %v1611_v55 }
0x26a6   :  { %v1494_v56 = vpop.permute.xlu1 %1493 }
0x26a7   :  { %v1496_v57 = vmul.f32 %v1494_v56, %v1474_v40 }
0x26a9   :  { %v2743_v37 = vsel %vm1502_vm5, %v1496_v57, %v1431_v13 }
0x26aa   :  { %1507 = vrot.lane.b32.xlu0 %v2743_v37, %s2302_s26  ;;  %v1575_v28 = vrot.slane %v2743_v37, 6 }
0x26c3   :  { %v1639_v33 = vpop.f32.mrf.mxu1 }
0x26c4   :  { %v2780_v34 = vadd.f32 %v1639_v33, %v1618_v27 }
0x271c   :  { %v1508_v11 = vpop.permute.xlu0 %1507 }
0x271d   :  { %2074 = vmatmul.msk.f32.vlgmr.msrb.gmra.mxu3 %vm98_vm7, %v1508_v11 }
0x27a0   :  { %v1528_v58 = vpop.f32.mrf.mxu3 }
0x27a1   :  { %v1532_v15 = vrot.slane %v1528_v58, 6 }
0x27a3   :  { %v1534_v59 = vadd.f32 %v1532_v15, %v2699_v18  ;;  %v1556_v18 = vrot.slane %v2753_v17, 6 }
0x27a5   :  { %2233 = vtanh.f32 %v1534_v59  ;;  %v2075_v61 = vmul.f32 -1.442695, %v1534_v59 }
0x27a7   :  { %2235 = vpow2.f32 %v2075_v61 }
0x27ab   :  { %v2234_v60 = vpop.eup %2233 }
0x27ac   :  { %1560 = vrot.lane.b32.xlu1 %v2234_v60, %s2301_s25 }
0x27ad   :  { %v2236_v62 = vpop.eup %2235 }
0x27ae   :  { %v1538_v63 = vadd.f32 1.0, %v2236_v62 }
0x27b0   :  { %2237 = vrcp.f32 %v1538_v63  ;;  %v1550_v3 = vand.u32 2147483648, %v1538_v63  ;;  %vm1544_vm12 = vweird.f32 %v1538_v63  ;;  %v1548_v4 = vand.u32 2147483647, %v1538_v63 }
0x27b2   :  { %v1551_v14 = vor.u32 1.1754944e-38, %v1550_v3  ;;  %vm1549_vm14 = vcmp.eq.f32.partialorder %v1548_v4, 8.507059e+37 }
0x27b6   :  { %v2238_v0 = vpop.eup %2237 }
0x27b7   :  { %v1540_v1 = vmul.f32 %v2238_v0, %v1538_v63  ;;  %vm1545_vm6 = vweird.f32 %v2238_v0 }
0x27b8   :  { %vm1546_vm13 = vmor %vm1544_vm12, %vm1545_vm6 }
0x27b9   :  { %v1541_v2 = vsub.f32 1.0, %v1540_v1 }
0x27bb   :  { %v1542_v8 = vmul.f32 %v2238_v0, %v1541_v2 }
0x27bd   :  { %v1543_v26 = vadd.f32 %v2238_v0, %v1542_v8 }
0x27bf   :  { %v1547_v5 = vsel %vm1546_vm13, %v2238_v0, %v1543_v26 }
0x27c0   :  { %v1552_v16 = vsel %vm1549_vm14, %v1551_v14, %v1547_v5 }
0x27c1   :  { %v1558_v19 = vmul.f32 %v1556_v18, %v1552_v16 }
0x281e   :  { %v1561_v13 = vpop.permute.xlu1 %1560 }
0x281f   :  { %v1563_v10 = vmul.f32 %v1561_v13, %v1552_v16 }
0x2821   :  { %1565 = vrot.lane.b32.xlu0 %v1563_v10, %s2302_s26 }
0x2893   :  { %v1566_v20 = vpop.permute.xlu0 %1565 }
0x2894   :  { %v2758_v21 = vadd.f32 %v1566_v20, %v1558_v19 }
0x2896   :  { %2239 = vtanh.f32 %v2758_v21  ;;  %v1578_v54 = vsel %vm1502_vm5, %v2758_v21, %v1556_v18 }
0x2897   :  { %v1690_v55 = vrot.slane %v1578_v54, 2  ;;  %v1724_v61 = vrot.slane %v1578_v54, 6 }
0x289c   :  { %v2240_v22 = vpop.eup %2239 }
0x289d   :  { %1571 = vrot.lane.b32.xlu1 %v2240_v22, %s2301_s25 }
0x290f   :  { %v1572_v9 = vpop.permute.xlu1 %1571 }
0x2910   :  { %v1574_v29 = vmul.f32 %v1572_v9, %v1552_v16 }
0x2912   :  { %v1577_v30 = vsel %vm1502_vm5, %v1574_v29, %v1575_v28 }
0x2913   :  { %v1643_v31 = vrot.slane %v1577_v30, 2  ;;  %v1714_v42 = vrot.slane %v1577_v30, 6 }
0x2915   :  { %1644 = vrot.lane.b32.xlu2 %v1643_v31, %s2302_s26 }
0x296f   :  { %v1645_v32 = vpop.permute.xlu2 %1644 }
0x2970   :  { %2079 = vmatmul.msk.f32.vlgmr.msra.gmra.mxu2 %vm98_vm7, %v1645_v32 }
0x29f3   :  { %v1665_v35 = vpop.f32.mrf.mxu2 }
0x29f4   :  { %v1668_v36 = vadd.f32 %v1665_v35, %v2780_v34 }
0x29f6   :  { %2241 = vtanh.f32 %v1668_v36  ;;  %v2080_v40 = vmul.f32 -1.442695, %v1668_v36 }
0x29f8   :  { %2243 = vpow2.f32 %v2080_v40 }
0x29fc   :  { %v2242_v39 = vpop.eup %2241 }
0x29fd   :  { %1694 = vrot.lane.b32.xlu0 %v2242_v39, %s2301_s25 }
0x29fe   :  { %v2244_v41 = vpop.eup %2243 }
0x29ff   :  { %v1672_v44 = vadd.f32 1.0, %v2244_v41 }
0x2a01   :  { %2245 = vrcp.f32 %v1672_v44  ;;  %v1684_v48 = vand.u32 2147483648, %v1672_v44  ;;  %vm1678_vm0 = vweird.f32 %v1672_v44  ;;  %v1682_v49 = vand.u32 2147483647, %v1672_v44 }
0x2a03   :  { %v1685_v50 = vor.u32 1.1754944e-38, %v1684_v48  ;;  %vm1683_vm3 = vcmp.eq.f32.partialorder %v1682_v49, 8.507059e+37 }
0x2a07   :  { %v2246_v45 = vpop.eup %2245 }
0x2a08   :  { %v1674_v38 = vmul.f32 %v2246_v45, %v1672_v44  ;;  %vm1679_vm15 = vweird.f32 %v2246_v45 }
0x2a09   :  { %vm1680_vm2 = vmor %vm1678_vm0, %vm1679_vm15 }
0x2a0a   :  { %v1675_v46 = vsub.f32 1.0, %v1674_v38 }
0x2a0c   :  { %v1676_v47 = vmul.f32 %v2246_v45, %v1675_v46  ;;  %v60_v46 = vld [vmem:[%s2853_s2 + $0x28] sm:$0xf] }
0x2a0e   :  { %v1677_v6 = vadd.f32 %v2246_v45, %v1676_v47 }
0x2a10   :  { %v1681_v7 = vsel %vm1680_vm2, %v2246_v45, %v1677_v6  ;;  %vm2010_vm2 = vcmask 8192  }
0x2a11   :  { %v1686_v52 = vsel %vm1683_vm3, %v1685_v50, %v1681_v7 }
0x2a12   :  { %v1692_v56 = vmul.f32 %v1690_v55, %v1686_v52 }
0x2a6f   :  { %v1695_v51 = vpop.permute.xlu0 %1694 }
0x2a70   :  { %v1697_v53 = vmul.f32 %v1695_v51, %v1686_v52 }
0x2a72   :  { %1699 = vrot.lane.b32.xlu1 %v1697_v53, %s2302_s26 }
0x2a7a   :  { %1715 = vrot.lane.b32.xlu1 %v1714_v42, %s2302_s26 }
0x2ae4   :  { %v1700_v57 = vpop.permute.xlu1 %1699 }
0x2ae5   :  { %v1702_v37 = vadd.f32 %v1700_v57, %v1692_v56 }
0x2ae7   :  { %2247 = vtanh.f32 %v1702_v37  ;;  %v1720_v58 = vrot.slane %v1702_v37, 4 }
0x2aec   :  { %v1716_v62 = vpop.permute.xlu1 %1715 }
0x2aed   :  { %v2248_v11 = vpop.eup %2247 }
0x2aee   :  { %1705 = vrot.lane.b32.xlu2 %v2248_v11, %s2301_s25 }
0x2af6   :  { %1721 = vrot.lane.b32.xlu2 %v1720_v58, %s2304_s28 }
0x2b48   :  { %v1706_v15 = vpop.permute.xlu2 %1705 }
0x2b49   :  { %v1708_v59 = vmul.f32 %v1706_v15, %v1686_v52 }
0x2b4b   :  { %v1710_v60 = vrot.slane %v1708_v59, 4 }
0x2b4d   :  { %1711 = vrot.lane.b32.xlu0 %v1710_v60, %s2302_s26 }
0x2b50   :  { %v1722_v2 = vpop.permute.xlu2 %1721 }
0x2b55   :  { %1725 = vrot.lane.b32.xlu0 %v1724_v61, %s2304_s28 }
0x2bbf   :  { %v1712_v63 = vpop.permute.xlu0 %1711 }
0x2bc0   :  { %v1718_v0 = vsel %vm1502_vm5, %v1712_v63, %v1716_v62 }
0x2bc1   :  { %v1730_v1 = vrot.slane %v1718_v0, 4  ;;  %v1804_v47 = vrot.slane %v1718_v0, 6 }
0x2bc3   :  { %2081 = vmatmul.msk.f32.vlgmr.msra.gmra.mxu3 %vm98_vm7, %v1730_v1 }
0x2bc7   :  { %v1726_v8 = vpop.permute.xlu0 %1725 }
0x2bc8   :  { %v1728_v26 = vsel %vm1502_vm5, %v1722_v2, %v1726_v8 }
0x2bc9   :  { %v1778_v3 = vrot.slane %v1728_v26, 2  ;;  %v1812_v44 = vrot.slane %v1728_v26, 6 }
0x2bcb   :  { %1779 = vrot.lane.b32.xlu2 %v1778_v3, %s2302_s26 }
0x2c25   :  { %v1780_v30 = vpop.permute.xlu2 %1779 }
0x2c46   :  { %v1750_v4 = vpop.f32.mrf.mxu3 }
0x2c47   :  { %v1754_v5 = vrot.slane %v1750_v4, 6 }
0x2c49   :  { %v1756_v14 = vadd.f32 %v1754_v5, %v2780_v34 }
0x2c4b   :  { %2249 = vtanh.f32 %v1756_v14  ;;  %v2082_v16 = vmul.f32 -1.442695, %v1756_v14 }
0x2c4d   :  { %2251 = vpow2.f32 %v2082_v16 }
0x2c51   :  { %v2250_v13 = vpop.eup %2249 }
0x2c52   :  { %1784 = vrot.lane.b32.xlu1 %v2250_v13, %s2301_s25 }
0x2c53   :  { %v2252_v10 = vpop.eup %2251 }
0x2c54   :  { %v1760_v17 = vadd.f32 1.0, %v2252_v10 }
0x2c56   :  { %2253 = vrcp.f32 %v1760_v17  ;;  %v1772_v23 = vand.u32 2147483648, %v1760_v17  ;;  %vm1766_vm4 = vweird.f32 %v1760_v17  ;;  %v1770_v24 = vand.u32 2147483647, %v1760_v17 }
0x2c58   :  { %v1773_v25 = vor.u32 1.1754944e-38, %v1772_v23  ;;  %vm1771_vm9 = vcmp.eq.f32.partialorder %v1770_v24, 8.507059e+37 }
0x2c5c   :  { %v2254_v18 = vpop.eup %2253 }
0x2c5d   :  { %v1762_v19 = vmul.f32 %v2254_v18, %v1760_v17  ;;  %vm1767_vm1 = vweird.f32 %v2254_v18 }
0x2c5e   :  { %vm1768_vm8 = vmor %vm1766_vm4, %vm1767_vm1 }
0x2c5f   :  { %v1763_v20 = vsub.f32 1.0, %v1762_v19 }
0x2c61   :  { %v1764_v21 = vmul.f32 %v2254_v18, %v1763_v20 }
0x2c63   :  { %v1765_v22 = vadd.f32 %v2254_v18, %v1764_v21 }
0x2c65   :  { %v1769_v12 = vsel %vm1768_vm8, %v2254_v18, %v1765_v22 }
0x2c66   :  { %v1774_v28 = vsel %vm1771_vm9, %v1773_v25, %v1769_v12 }
0x2c67   :  { %v1782_v31 = vmul.f32 %v1780_v30, %v1774_v28 }
0x2cc4   :  { %v1785_v9 = vpop.permute.xlu1 %1784 }
0x2cc5   :  { %v1787_v29 = vmul.f32 %v1785_v9, %v1774_v28 }
0x2cc7   :  { %1789 = vrot.lane.b32.xlu0 %v1787_v29, %s2302_s26 }
0x2d39   :  { %v1790_v32 = vpop.permute.xlu0 %1789 }
0x2d3a   :  { %v1792_v27 = vadd.f32 %v1790_v32, %v1782_v31 }
0x2d3c   :  { %2255 = vtanh.f32 %v1792_v27  ;;  %v1808_v33 = vrot.slane %v1792_v27, 4 }
0x2d3e   :  { %1809 = vrot.lane.b32.xlu0 %v1808_v33, %s2304_s28 }
0x2d42   :  { %v2256_v35 = vpop.eup %2255 }
0x2d43   :  { %1795 = vrot.lane.b32.xlu1 %v2256_v35, %s2301_s25 }
0x2db0   :  { %v1810_v41 = vpop.permute.xlu0 %1809 }
0x2db1   :  { %v1814_v45 = vsel %vm1502_vm5, %v1810_v41, %v1812_v44 }
0x2db2   :  { %v1864_v38 = vrot.slane %v1814_v45, 2  ;;  %v1903_v13 = vrot.slane %v1814_v45, 6 }
0x2db5   :  { %v1796_v36 = vpop.permute.xlu1 %1795 }
0x2db6   :  { %v1798_v39 = vmul.f32 %v1796_v36, %v1774_v28 }
0x2db8   :  { %v1800_v40 = vrot.slane %v1798_v39, 4 }
0x2dba   :  { %1801 = vrot.lane.b32.xlu2 %v1800_v40, %s2302_s26 }
0x2dc2   :  { %1865 = vrot.lane.b32.xlu2 %v1864_v38, %s2302_s26 }
0x2dca   :  { %1887 = vperm.xlu2 %2095, %v60_v46   ;;  %v1984_v46 = vld [vmem:[%s2859_s8 + $0x18] sm:$0xff] }
0x2dcb   :  { %2002 = vmatpush.msrb.mxu2 %v1984_v46 }
0x2e14   :  { %v1802_v6 = vpop.permute.xlu2 %1801 }
0x2e15   :  { %v1806_v48 = vsel %vm1502_vm5, %v1802_v6, %v1804_v47  ;;  %v1983_v47 = vld [vmem:[%s2859_s8 + $0x10] sm:$0xff]  ;;  %v1982_v6 = vld [vmem:[%s2859_s8 + $0x8] sm:$0xff] }
0x2e16   :  { %v1816_v49 = vrot.slane %v1806_v48, 6  ;;  %2003 = vmatpush.msrb.mxu2 %v1983_v47 }
0x2e18   :  { %2083 = vmatmul.msk.f32.vlgmr.msra.gmra.mxu0 %vm98_vm7, %v1816_v49  ;;  %2004 = vmatpush.msrb.mxu2 %v1982_v6 }
0x2e1c   :  { %v1866_v63 = vpop.permute.xlu2 %1865 }
0x2e24   :  { %v1888_v14 = vpop.permute.xlu2 %1887 }
0x2e25   :  { %vm1890_vm12 = vcmp.gt.f32.partialorder %v1888_v14, 0.0 }
0x2e95   :  { %v1836_v7 = vpop.f32.mrf.mxu0 }
0x2e96   :  { %v1840_v50 = vrot.slane %v1836_v7, 4 }
0x2e98   :  { %v1842_v51 = vadd.f32 %v1840_v50, %v2780_v34  ;;  %v1981_v50 = vld [vmem:[%s2859_s8] sm:$0xff] }
0x2e99   :  { %2005 = vmatpush.msrb.mxu2 %v1981_v50 }
0x2e9a   :  { %2257 = vtanh.f32 %v1842_v51  ;;  %v2084_v53 = vmul.f32 -1.442695, %v1842_v51 }
0x2e9c   :  { %2259 = vpow2.f32 %v2084_v53 }
0x2ea0   :  { %v2258_v52 = vpop.eup %2257 }
0x2ea1   :  { %1870 = vrot.lane.b32.xlu1 %v2258_v52, %s2301_s25 }
0x2ea2   :  { %v2260_v42 = vpop.eup %2259 }
0x2ea3   :  { %v1846_v54 = vadd.f32 1.0, %v2260_v42  ;;  %v1985_v42 = vld [vmem:[%s2859_s8 + $0x20] sm:$0x1] }
0x2ea5   :  { %2261 = vrcp.f32 %v1846_v54  ;;  %v1858_v11 = vand.u32 2147483648, %v1846_v54  ;;  %vm1852_vm11 = vweird.f32 %v1846_v54  ;;  %v1856_v58 = vand.u32 2147483647, %v1846_v54 }
0x2ea7   :  { %v1859_v59 = vor.u32 1.1754944e-38, %v1858_v11  ;;  %vm1857_vm6 = vcmp.eq.f32.partialorder %v1856_v58, 8.507059e+37 }
0x2eab   :  { %v2262_v55 = vpop.eup %2261 }
0x2eac   :  { %v1848_v56 = vmul.f32 %v2262_v55, %v1846_v54  ;;  %vm1853_vm10 = vweird.f32 %v2262_v55 }
0x2ead   :  { %vm1854_vm5 = vmor %vm1852_vm11, %vm1853_vm10 }
0x2eae   :  { %v1849_v43 = vsub.f32 1.0, %v1848_v56 }
0x2eb0   :  { %v1850_v57 = vmul.f32 %v2262_v55, %v1849_v43 }
0x2eb2   :  { %v1851_v37 = vadd.f32 %v2262_v55, %v1850_v57 }
0x2eb4   :  { %v1855_v15 = vsel %vm1854_vm5, %v2262_v55, %v1851_v37 }
0x2eb5   :  { %v1860_v61 = vsel %vm1857_vm6, %v1859_v59, %v1855_v15 }
0x2eb6   :  { %v1868_v0 = vmul.f32 %v1866_v63, %v1860_v61 }
0x2f13   :  { %v1871_v60 = vpop.permute.xlu1 %1870 }
0x2f14   :  { %v1873_v62 = vmul.f32 %v1871_v60, %v1860_v61 }
0x2f16   :  { %1875 = vrot.lane.b32.xlu0 %v1873_v62, %s2302_s26 }
0x2f88   :  { %v1876_v1 = vpop.permute.xlu0 %1875 }
0x2f89   :  { %v1878_v2 = vadd.f32 %v1876_v1, %v1868_v0 }
0x2f8b   :  { %2263 = vtanh.f32 %v1878_v2  ;;  %v1899_v26 = vrot.slane %v1878_v2, 4 }
0x2f91   :  { %v2264_v8 = vpop.eup %2263 }
0x2f92   :  { %1881 = vrot.lane.b32.xlu1 %v2264_v8, %s2301_s25 }
0x2f9a   :  { %1900 = vrot.lane.b32.xlu1 %v1899_v26, %s2304_s28 }
0x3004   :  { %v1882_v3 = vpop.permute.xlu1 %1881 }
0x3005   :  { %v1884_v4 = vmul.f32 %v1882_v3, %v1860_v61 }
0x3007   :  { %v1892_v5 = vrot.slane %v1884_v4, 4 }
0x3009   :  { %1893 = vrot.lane.b32.xlu0 %v1892_v5, %s2302_s26 }
0x300c   :  { %v1901_v16 = vpop.permute.xlu1 %1900 }
0x300d   :  { %v1905_v10 = vsel %vm1890_vm12, %v1901_v16, %v1903_v13 }
0x300e   :  { %v1954_v17 = vrot.slane %v1905_v10, 2 }
0x3011   :  { %1955 = vrot.lane.b32.xlu0 %v1954_v17, %s2302_s26 }
0x307b   :  { %v1894_v18 = vpop.permute.xlu0 %1893 }
0x307c   :  { %v1897_v19 = vsel %vm1890_vm12, %v1894_v18, %v1816_v49 }
0x307d   :  { %2085 = vmatmul.msk.f32.vlgmr.msrb.gmra.mxu1 %vm98_vm7, %v1897_v19 }
0x3083   :  { %v1956_v40 = vpop.permute.xlu0 %1955 }
0x30fa   :  { %v1926_v20 = vpop.f32.mrf.mxu1 }
0x30fb   :  { %v1930_v21 = vrot.slane %v1926_v20, 2 }
0x30fd   :  { %v1932_v22 = vadd.f32 %v1930_v21, %v2780_v34 }
0x30ff   :  { %2265 = vtanh.f32 %v1932_v22  ;;  %v2086_v24 = vmul.f32 -1.442695, %v1932_v22 }
0x3101   :  { %2267 = vpow2.f32 %v2086_v24 }
0x3105   :  { %v2266_v23 = vpop.eup %2265 }
0x3106   :  { %1960 = vrot.lane.b32.xlu2 %v2266_v23, %s2301_s25 }
0x3107   :  { %v2268_v12 = vpop.eup %2267 }
0x3108   :  { %v1936_v25 = vadd.f32 1.0, %v2268_v12 }
0x310a   :  { %2269 = vrcp.f32 %v1936_v25  ;;  %v1948_v32 = vand.u32 2147483648, %v1936_v25  ;;  %vm1942_vm14 = vweird.f32 %v1936_v25  ;;  %v1946_v27 = vand.u32 2147483647, %v1936_v25 }
0x310c   :  { %v1949_v33 = vor.u32 1.1754944e-38, %v1948_v32  ;;  %vm1947_vm0 = vcmp.eq.f32.partialorder %v1946_v27, 8.507059e+37 }
0x3110   :  { %v2270_v9 = vpop.eup %2269 }
0x3111   :  { %v1938_v28 = vmul.f32 %v2270_v9, %v1936_v25  ;;  %vm1943_vm13 = vweird.f32 %v2270_v9 }
0x3112   :  { %vm1944_vm15 = vmor %vm1942_vm14, %vm1943_vm13 }
0x3113   :  { %v1939_v29 = vsub.f32 1.0, %v1938_v28 }
0x3115   :  { %v1940_v30 = vmul.f32 %v2270_v9, %v1939_v29 }
0x3117   :  { %v1941_v31 = vadd.f32 %v2270_v9, %v1940_v30 }
0x3119   :  { %v1945_v34 = vsel %vm1944_vm15, %v2270_v9, %v1941_v31 }
0x311a   :  { %v1950_v36 = vsel %vm1947_vm0, %v1949_v33, %v1945_v34 }
0x311b   :  { %v1958_v41 = vmul.f32 %v1956_v40, %v1950_v36 }
0x3160   :  { %v1961_v35 = vpop.permute.xlu2 %1960 }
0x3161   :  { %v1963_v39 = vmul.f32 %v1961_v35, %v1950_v36 }
0x3163   :  { %1965 = vrot.lane.b32.xlu1 %v1963_v39, %s2302_s26 }
0x31d5   :  { %v1966_v44 = vpop.permute.xlu1 %1965 }
0x31d6   :  { %v1968_v45 = vadd.f32 %v1966_v44, %v1958_v41 }
0x31d8   :  { %2271 = vtanh.f32 %v1968_v45 }
0x31de   :  { %v2272_v38 = vpop.eup %2271 }
0x31df   :  { %1971 = vrot.lane.b32.xlu2 %v2272_v38, %s2301_s25 }
0x3239   :  { %v1972_v48 = vpop.permute.xlu2 %1971 }
0x323a   :  { %v1974_v49 = vmul.f32 %v1972_v48, %v1950_v36 }
0x323c   :  { %v1976_v7 = vrot.slane %v1974_v49, 4 }
0x323e   :  { %1977 = vrot.lane.b32.xlu0 %v1976_v7, %s2302_s26  ;;  %s2019_s26 = sshll.u32 %s2860_s9, 4  ;;  %s2020_s26 = int_to_ptr.hbm [resolvable:$true] %s2019_s26 }
0x32b0   :  { %v1978_v51 = vpop.permute.xlu0 %1977 }
0x32b1   :  { %v1980_v52 = vsel %vm1890_vm12, %v1978_v51, 0.0 }
0x32b2   :  { %v1987_v53 = vrot.slane %v1980_v52, 3 }
0x32b4   :  { %2087 = vmatmul.msk.f32.vlgmr.msrb.gmra.mxu2 %vm98_vm7, %v1987_v53 }
0x3337   :  { %v2007_v54 = vpop.f32.mrf.mxu2 }
0x3338   :  { %v2008_v55 = vadd.f32 %v2007_v54, %v1985_v42 }
0x333a   :  { %2011 = vst.msk [vmem:[#allocation2] sm:$0x1] %vm2010_vm2, %v2008_v55 }
0x333b   :  { %2022 = dma.vmem_to_hbm [thread:$0]  %s2018_s7, 16, %s2020_s26, [#allocation3]  }
0x333c   :  { %2298 = dma.done.wait [#allocation3], 16  }
0x333d   :  { %2299 = vsyncadd [#allocation3], 4294967280 }
0x333e   :  { %2027 = vsyncpa [#allocation3], 1 }

</bundles_post_ra>
